<compile_context>
chip_gen: v5e
topology: v5e:2x2
jax: 0.10.0
libtpu: 0.0.40
codegen_flags: <defaults>
</compile_context>

<pallas_src>
import functools

import jax
import jax.numpy as jnp
from jax import lax
from jax.experimental import pallas as pl
from jax.experimental.pallas import tpu as pltpu

H1 = 64        # hidden 1
H2 = 32        # hidden 2
_LANE = 128    # TPU lane width
_SUB = 8       # f32 sublane tiling
_CHUNK = 1024  # rows of the resident x tile processed per inner-loop step


def _round_up(x, m):
    return ((x + m - 1) // m) * m


def _critic_kernel(x_ref, w1_ref, b1_ref, w2_ref, b2_ref, w3_ref, b3_ref, o_ref,
                   *, num_chunks, chunk):
    # Loop-invariant operands: load once before the chunk loop.
    w1 = w1_ref[...]            # [S, 64]   compute dtype
    w2 = w2_ref[...]            # [64, 32]  compute dtype
    w3 = w3_ref[...]            # [8, 32]   compute dtype (row 0 = w3^T, rest 0)
    b1 = b1_ref[...]            # [1, 64]   f32
    b2 = b2_ref[...]            # [1, 32]   f32
    b3 = b3_ref[0]              # scalar    f32 (SMEM)

    def body(c, carry):
        r0 = pl.multiple_of(c * chunk, chunk)
        xc = x_ref[pl.ds(r0, chunk), :]                     # [chunk, S]

        # Layer 1: [chunk, S] @ [S, 64] -> [chunk, 64]; f32 accumulate + epilogue.
        h1 = jnp.dot(xc, w1, preferred_element_type=jnp.float32)
        h1 = jnp.maximum(h1 + b1, 0.0)

        # Layer 2: [chunk, 64] @ [64, 32] -> [chunk, 32]
        h2 = jnp.dot(h1.astype(w2.dtype), w2, preferred_element_type=jnp.float32)
        h2 = jnp.maximum(h2 + b2, 0.0)

        # Layer 3 (lane-dense "NT" epilogue): s[r, b] = sum_k w3[r, k] * h2[b, k].
        # Row 0 is the real result, already lane-dense (batch on lanes).
        s = lax.dot_general(w3, h2.astype(w3.dtype),
                            dimension_numbers=(((1,), (1,)), ((), ())),
                            preferred_element_type=jnp.float32)   # [8, chunk]
        o_ref[:, pl.ds(r0, chunk)] = s[0:1, :] + b3
        return carry

    lax.fori_loop(0, num_chunks, body, 0)


def _pick_block_batch(B, itemsize, vmem_budget_bytes):
    """Largest batch tile (multiple of _CHUNK) that fits the VMEM budget.

    Uses lane-padded accounting: a (bt, S<=128) block occupies bt*128*itemsize
    bytes per VMEM buffer regardless of S.
    """
    per_row = 2 * _LANE * itemsize          # double-buffered x tile (lane-padded)
    per_row += 2 * _SUB * 4                 # double-buffered (1, bt) f32 out tile
    fixed = _CHUNK * _LANE * itemsize       # x chunk slice
    fixed += _CHUNK * 2 * _LANE * 4         # f32 h1 / h2 chunk temporaries
    fixed += _SUB * _CHUNK * 4              # [8, chunk] layer-3 result
    fixed += (1 << 20)                      # resident weights / biases / slack
    cap = max(_CHUNK, ((vmem_budget_bytes - fixed) // per_row) // _CHUNK * _CHUNK)

    needed = _round_up(max(B, 1), _CHUNK)
    bt = min(cap, needed)
    # Keep >= 2 grid steps when the batch allows so the "parallel" grid axis can
    # feed both of v7x's TensorCores.
    if needed >= 2 * _CHUNK:
        bt = min(bt, _round_up(pl.cdiv(B, 2), _CHUNK))
    return max(bt, _CHUNK)


def critic_forward(x, params, *, block_batch=None, vmem_budget_bytes=32 << 20):
    """Critic MLP forward.  x: [B, state_dim] (f32 or bf16) -> [B, 1] float32.

    The compute dtype follows x.dtype (no wrapper-side astype of x — that would
    add a full extra HBM read+write).  Callers that need f32-exact results must
    pass f32 x; a bf16 x halves the dominant HBM read at ~1e-2 relative error.
    """
    w1, b1, w2, b2, w3, b3 = params
    B, S = x.shape
    cdtype = x.dtype
    itemsize = jnp.dtype(cdtype).itemsize

    # ---- batch tile sized from the VMEM budget (lane-padded accounting) ------
    bt = _pick_block_batch(B, itemsize, vmem_budget_bytes)
    if block_batch is not None:
        bt = max(_CHUNK, min(bt, _round_up(block_batch, _CHUNK)))
    num_tiles = pl.cdiv(B, bt)          # no padding of x: edge block is clipped
    num_chunks = bt // _CHUNK

    # ---- operand prep: weights only (a few KiB); x is consumed as-is ---------
    w1c = w1.astype(cdtype)                                     # [S, 64]
    w2c = w2.astype(cdtype)                                     # [64, 32]
    # w3: [32, 1] -> transposed row, zero-padded to 8 sublanes: [8, 32]
    w3_pad = jnp.zeros((_SUB, H2), cdtype).at[0:1, :].set(
        w3.reshape(1, H2).astype(cdtype))
    b1f = b1.reshape(1, H1).astype(jnp.float32)
    b2f = b2.reshape(1, H2).astype(jnp.float32)
    b3f = b3.reshape(-1)[:1].astype(jnp.float32)                # (1,) -> SMEM

    # ---- VMEM footprint with lane/sublane-padded layouts ---------------------
    lane_pad = lambda n: _round_up(n, _LANE)
    sub_pad = lambda n: _round_up(n, _SUB)
    est = 2 * bt * lane_pad(S) * itemsize                       # x tile (x2 buffers)
    est += 2 * _SUB * bt * 4                                    # (1, bt) f32 out tile (x2)
    est += sub_pad(S) * lane_pad(H1) * itemsize                 # w1
    est += sub_pad(H1) * lane_pad(H2) * itemsize                # w2
    est += _SUB * lane_pad(H2) * itemsize                       # w3 (padded)
    est += 2 * _SUB * _LANE * 4                                 # biases
    est += _CHUNK * lane_pad(S) * itemsize                      # x chunk slice
    est += _CHUNK * (lane_pad(H1) + lane_pad(H2)) * 4           # h1 / h2 f32
    est += _SUB * _CHUNK * 4                                    # [8, chunk] result
    vmem_limit = min(int(est * 1.25) + (2 << 20), 56 << 20)

    kernel = functools.partial(_critic_kernel, num_chunks=num_chunks, chunk=_CHUNK)

    out = pl.pallas_call(
        kernel,
        out_shape=jax.ShapeDtypeStruct((1, B), jnp.float32),
        grid=(num_tiles,),
        in_specs=[
            pl.BlockSpec((bt, S), lambda i: (i, 0)),             # x: streamed
            pl.BlockSpec((S, H1), lambda i: (0, 0)),             # w1: resident
            pl.BlockSpec((1, H1), lambda i: (0, 0)),             # b1: resident
            pl.BlockSpec((H1, H2), lambda i: (0, 0)),            # w2: resident
            pl.BlockSpec((1, H2), lambda i: (0, 0)),             # b2: resident
            pl.BlockSpec((_SUB, H2), lambda i: (0, 0)),          # w3 (padded): resident
            pl.BlockSpec(memory_space=pltpu.MemorySpace.SMEM),   # b3 scalar
        ],
        out_specs=pl.BlockSpec((1, bt), lambda i: (0, i)),       # lane-dense output
        compiler_params=pltpu.CompilerParams(
            dimension_semantics=("parallel",),
            vmem_limit_bytes=vmem_limit),
    )(x, w1c, b1f, w2c, b2f, w3_pad, b3f)

    # [1, B] -> [B, 1]  (metadata-only reshape)
    return out.reshape(B, 1)


def _init_linear(key, fan_in, fan_out):
    # Mirrors PyTorch nn.Linear default init: U(-1/sqrt(fan_in), 1/sqrt(fan_in))
    kw, kb = jax.random.split(key)
    bound = 1.0 / jnp.sqrt(jnp.float32(fan_in))
    w = jax.random.uniform(kw, (fan_in, fan_out), jnp.float32, -bound, bound)
    b = jax.random.uniform(kb, (1, fan_out), jnp.float32, -bound, bound)
    return w, b


def _reference(x, params):
    w1, b1, w2, b2, w3, b3 = params
    h = jnp.maximum(x.astype(jnp.float32) @ w1 + b1, 0.0)
    h = jnp.maximum(h @ w2 + b2, 0.0)
    return h @ w3 + b3


if __name__ == "__main__":
    state_dim = 16
    batch = 8

    key = jax.random.PRNGKey(0)
    k_x, k1, k2, k3 = jax.random.split(key, 4)

    x = jax.random.normal(k_x, (batch, state_dim), jnp.float32)
    params = (*_init_linear(k1, state_dim, H1),
              *_init_linear(k2, H1, H2),
              *_init_linear(k3, H2, 1))

    ref = _reference(x, params)

    # f32 path (exact-ish; default when x arrives f32).
    out_f32 = jax.block_until_ready(critic_forward(x, params))
    assert out_f32.shape == (batch, 1)
    assert jnp.allclose(out_f32, ref, atol=1e-4, rtol=1e-4), "f32 mismatch"

    # bf16-input path: cast assumed to happen upstream (x "arrives" bf16); the
    # kernel keeps f32 accumulation and an f32 bias/ReLU epilogue (v5e-safe).
    x_bf16 = x.astype(jnp.bfloat16)
    out_bf16 = jax.block_until_ready(critic_forward(x_bf16, params))
    assert out_bf16.shape == (batch, 1)
    assert jnp.allclose(out_bf16, _reference(x_bf16, params),
                        atol=5e-2, rtol=5e-2), "bf16 mismatch"

    # Multi-tile + partial edge-block path (no wrapper-side padding of x).
    big_b = 2500
    xb = jax.random.normal(k_x, (big_b, state_dim), jnp.float32)
    out_big = jax.block_until_ready(critic_forward(xb, params, block_batch=1024))
    assert out_big.shape == (big_b, 1)
    assert jnp.allclose(out_big, _reference(xb, params),
                        atol=1e-4, rtol=1e-4), "multi-tile mismatch"

    print("KERNEL_OK")
</pallas_src>

<mosaic_0001>
module attributes {stable_mosaic.version = 11 : i64} {
  func.func @_critic_kernel(%arg0: i32, %arg1: memref<1024x16xf32, #tpu.memory_space<vmem>>, %arg2: memref<16x64xf32, #tpu.memory_space<vmem>>, %arg3: memref<1x64xf32, #tpu.memory_space<vmem>>, %arg4: memref<64x32xf32, #tpu.memory_space<vmem>>, %arg5: memref<1x32xf32, #tpu.memory_space<vmem>>, %arg6: memref<8x32xf32, #tpu.memory_space<vmem>>, %arg7: memref<1xf32, #tpu.memory_space<smem>>, %arg8: memref<1x1024xf32, #tpu.memory_space<vmem>>) attributes {dimension_semantics = [#tpu.dimension_semantics<parallel>], iteration_bounds = array<i64: 1>, scalar_prefetch = 0 : i64, scratch_operands = 0 : i64, tpu.core_type = #tpu.core_type<tc>, window_params = [{transform_indices = @transform_0, window_bounds = array<i64: 1024, 16>}, {pipeline_mode = #tpu.pipeline_mode<synchronous>, transform_indices = @transform_1, window_bounds = array<i64: 16, 64>}, {pipeline_mode = #tpu.pipeline_mode<synchronous>, transform_indices = @transform_2, window_bounds = array<i64: 1, 64>}, {pipeline_mode = #tpu.pipeline_mode<synchronous>, transform_indices = @transform_3, window_bounds = array<i64: 64, 32>}, {pipeline_mode = #tpu.pipeline_mode<synchronous>, transform_indices = @transform_4, window_bounds = array<i64: 1, 32>}, {pipeline_mode = #tpu.pipeline_mode<synchronous>, transform_indices = @transform_5, window_bounds = array<i64: 8, 32>}, {transform_indices = @transform_6, window_bounds = array<i64: 1>}, {transform_indices = @transform_7, window_bounds = array<i64: 1, 1024>}]} {
    %c0 = arith.constant 0 : index
    %c0_0 = arith.constant 0 : index
    %0 = vector.load %arg2[%c0, %c0_0] : memref<16x64xf32, #tpu.memory_space<vmem>>, vector<16x64xf32>
    %c0_1 = arith.constant 0 : index
    %c0_2 = arith.constant 0 : index
    %1 = vector.load %arg4[%c0_1, %c0_2] : memref<64x32xf32, #tpu.memory_space<vmem>>, vector<64x32xf32>
    %c0_3 = arith.constant 0 : index
    %c0_4 = arith.constant 0 : index
    %2 = vector.load %arg6[%c0_3, %c0_4] : memref<8x32xf32, #tpu.memory_space<vmem>>, vector<8x32xf32>
    %c0_5 = arith.constant 0 : index
    %c0_6 = arith.constant 0 : index
    %3 = vector.load %arg3[%c0_5, %c0_6] : memref<1x64xf32, #tpu.memory_space<vmem>>, vector<1x64xf32>
    %c0_7 = arith.constant 0 : index
    %c0_8 = arith.constant 0 : index
    %4 = vector.load %arg5[%c0_7, %c0_8] : memref<1x32xf32, #tpu.memory_space<vmem>>, vector<1x32xf32>
    %c0_9 = arith.constant 0 : index
    %5 = memref.load %arg7[%c0_9] : memref<1xf32, #tpu.memory_space<smem>>
    %c0_i32 = arith.constant 0 : i32
    %c1024_i32 = arith.constant 1024 : i32
    %6 = arith.muli %c0_i32, %c1024_i32 : i32
    %7 = tpu.assume_multiple %6, 1024 : i32
    %8 = arith.index_cast %7 : i32 to index
    %c0_10 = arith.constant 0 : index
    %9 = vector.load %arg1[%8, %c0_10] : memref<1024x16xf32, #tpu.memory_space<vmem>>, vector<1024x16xf32>
    %cst = arith.constant dense<0.000000e+00> : vector<1024x64xf32>
    %10 = tpu.matmul %9, %0, %cst {dimension_numbers = #tpu.dot_dimension_numbers<[1], [0], [0], [1], [0, 0, 1, 1], [], []>} : vector<1024x16xf32>, vector<16x64xf32>, vector<1024x64xf32> -> vector<1024x64xf32>
    %11 = vector.broadcast %3 : vector<1x64xf32> to vector<1024x64xf32>
    %12 = arith.addf %10, %11 : vector<1024x64xf32>
    %cst_11 = arith.constant 0.000000e+00 : f32
    %13 = vector.broadcast %cst_11 : f32 to vector<1024x64xf32>
    %14 = arith.maximumf %12, %13 : vector<1024x64xf32>
    %cst_12 = arith.constant dense<0.000000e+00> : vector<1024x32xf32>
    %15 = tpu.matmul %14, %1, %cst_12 {dimension_numbers = #tpu.dot_dimension_numbers<[1], [0], [0], [1], [0, 0, 1, 1], [], []>} : vector<1024x64xf32>, vector<64x32xf32>, vector<1024x32xf32> -> vector<1024x32xf32>
    %16 = vector.broadcast %4 : vector<1x32xf32> to vector<1024x32xf32>
    %17 = arith.addf %15, %16 : vector<1024x32xf32>
    %cst_13 = arith.constant 0.000000e+00 : f32
    %18 = vector.broadcast %cst_13 : f32 to vector<1024x32xf32>
    %19 = arith.maximumf %17, %18 : vector<1024x32xf32>
    %cst_14 = arith.constant dense<0.000000e+00> : vector<8x1024xf32>
    %20 = tpu.matmul %2, %19, %cst_14 {dimension_numbers = #tpu.dot_dimension_numbers<[1], [1], [0], [0], [0, 0, 1, 0], [], []>} : vector<8x32xf32>, vector<1024x32xf32>, vector<8x1024xf32> -> vector<8x1024xf32>
    %21 = vector.extract_strided_slice %20 {offsets = [0, 0], sizes = [1, 1024], strides = [1, 1]} : vector<8x1024xf32> to vector<1x1024xf32>
    %22 = vector.broadcast %5 : f32 to vector<1x1024xf32>
    %23 = arith.addf %21, %22 : vector<1x1024xf32>
    %c0_15 = arith.constant 0 : index
    %24 = arith.index_cast %7 : i32 to index
    %25 = vector.load %arg8[%c0_15, %24] : memref<1x1024xf32, #tpu.memory_space<vmem>>, vector<1x1024xf32>
    tpu.vector_store %arg8[%c0_15, %24], %23 {strides = array<i32>} : memref<1x1024xf32, #tpu.memory_space<vmem>>, vector<1x1024xf32>,
    %c1_i32 = arith.constant 1 : i32
    return
  }
  func.func @transform_0(%arg0: i32) -> (i32, i32) {
    %c0_i32 = arith.constant 0 : i32
    %c0_i32_0 = arith.constant 0 : i32
    return %arg0, %c0_i32 : i32, i32
  }
  func.func @transform_1(%arg0: i32) -> (i32, i32) {
    %c0_i32 = arith.constant 0 : i32
    %c0_i32_0 = arith.constant 0 : i32
    %c0_i32_1 = arith.constant 0 : i32
    return %c0_i32, %c0_i32_0 : i32, i32
  }
  func.func @transform_2(%arg0: i32) -> (i32, i32) {
    %c0_i32 = arith.constant 0 : i32
    %c0_i32_0 = arith.constant 0 : i32
    %c0_i32_1 = arith.constant 0 : i32
    return %c0_i32, %c0_i32_0 : i32, i32
  }
  func.func @transform_3(%arg0: i32) -> (i32, i32) {
    %c0_i32 = arith.constant 0 : i32
    %c0_i32_0 = arith.constant 0 : i32
    %c0_i32_1 = arith.constant 0 : i32
    return %c0_i32, %c0_i32_0 : i32, i32
  }
  func.func @transform_4(%arg0: i32) -> (i32, i32) {
    %c0_i32 = arith.constant 0 : i32
    %c0_i32_0 = arith.constant 0 : i32
    %c0_i32_1 = arith.constant 0 : i32
    return %c0_i32, %c0_i32_0 : i32, i32
  }
  func.func @transform_5(%arg0: i32) -> (i32, i32) {
    %c0_i32 = arith.constant 0 : i32
    %c0_i32_0 = arith.constant 0 : i32
    %c0_i32_1 = arith.constant 0 : i32
    return %c0_i32, %c0_i32_0 : i32, i32
  }
  func.func @transform_6(%arg0: i32) -> i32 {
    %c0_i32 = arith.constant 0 : i32
    %c0_i32_0 = arith.constant 0 : i32
    return %c0_i32 : i32
  }
  func.func @transform_7(%arg0: i32) -> (i32, i32) {
    %c0_i32 = arith.constant 0 : i32
    %c0_i32_0 = arith.constant 0 : i32
    return %c0_i32, %arg0 : i32, i32
  }
}

</mosaic_0001>

<bundles_post_ra>
// kernel: tpu_custom_call.1
= control target key start
LH: loop header
LB: loop body
LE: loop exit
PB: predicated region body
PF: predicated region fallthrough
CT: control target
= control target key end

     0   :  { %13 = vsyncpa [#allocation4], 0  ;;  %vm173_vm0 = vcmask 130048   ;;  %vm1090_vm1 = vcmask 523264   ;;  %vm2004_vm2 = vcmask 261120   ;;  %vm2576_vm3 = vcmask 1040384   ;;  %s4486_s0 = inlined_call_operand.vmem [shape: f32[8,16], index: 0, kind: input, shape index: {}]   ;;  %s4487_s1 = inlined_call_operand.vmem [shape: f32[16,64], index: 1, kind: input, shape index: {}]   ;;  %s4488_s2 = inlined_call_operand.vmem [shape: f32[1,64], index: 2, kind: input, shape index: {}]   ;;  %s4489_s3 = inlined_call_operand.vmem [shape: f32[64,32], index: 3, kind: input, shape index: {}]   ;;  %s4490_s4 = inlined_call_operand.vmem [shape: f32[1,32], index: 4, kind: input, shape index: {}]   ;;  %s4491_s5 = inlined_call_operand.vmem [shape: f32[8,32], index: 5, kind: input, shape index: {}]   ;;  %s4492_s6 = inlined_call_operand.<no memory space> [shape: f32[1], index: 6, kind: input, shape index: {}]   ;;  %s4493_s7 = inlined_call_operand.hbm [shape: f32[1,8], index: 7, kind: output, shape index: {}]  }
   0x1   :  { %v29_v0 = vld [vmem:[%s4487_s1 + $0x8] sm:$0xff]  ;;  %v28_v1 = vld [vmem:[%s4487_s1] sm:$0xff]  ;;  %v44_v4 = vld [vmem:[%s4486_s0 + $0x10] sm:$0xff]  ;;  %vm2578_vm4 = vcmask 1042434   ;;  %vm2582_vm5 = vcmask 1044484   ;;  %vm2584_vm6 = vcmask 1046534  }
   0x2   :  { %572 = vmatpush.msra.mxu0 %v29_v0  ;;  %v42_v2 = vld [vmem:[%s4486_s0] sm:$0xff]  ;;  %3000 = vmatpush.msra.mxu3 %v29_v0  ;;  %v43_v3 = vld [vmem:[%s4486_s0 + $0x8] sm:$0xff]  ;;  %v45_v5 = vld [vmem:[%s4486_s0 + $0x18] sm:$0xff]  ;;  %vm2580_vm7 = vcmask 1041408   ;;  %vm2586_vm8 = vcmask 1045508   ;;  %vm2588_vm9 = vcmask 1043456  }
   0x3   :  { %v46_v6 = vld [vmem:[%s4486_s0 + $0x20] sm:$0xff]  ;;  %v47_v7 = vld [vmem:[%s4486_s0 + $0x28] sm:$0xff]  ;;  %v48_v8 = vld [vmem:[%s4486_s0 + $0x30] sm:$0xff] }
   0x4   :  { %573 = vmatpush.msra.mxu0 %v28_v1  ;;  %3001 = vmatpush.msra.mxu3 %v28_v1  ;;  %v49_v9 = vld [vmem:[%s4486_s0 + $0x38] sm:$0xff]  ;;  %v50_v10 = vld [vmem:[%s4486_s0 + $0x40] sm:$0xff]  ;;  %v51_v11 = vld [vmem:[%s4486_s0 + $0x48] sm:$0xff] }
   0x5   :  { %2608 = vmatmul.msk.f32.vlgmr.msra.gmra.mxu0 %vm173_vm0, %v42_v2  ;;  %v52_v12 = vld [vmem:[%s4486_s0 + $0x50] sm:$0xff]  ;;  %v37_v13 = vld [vmem:[%s4489_s3 + $0x38] sm:$0xff]  ;;  %v35_v15 = vld [vmem:[%s4489_s3 + $0x28] sm:$0xff] }
   0x6   :  { %v36_v14 = vld [vmem:[%s4489_s3 + $0x30] sm:$0xff]  ;;  %1483 = vmatpush.msra.mxu1 %v37_v13  ;;  %3002 = vmatpush.msra.mxu2 %v37_v13  ;;  %v53_v16 = vld [vmem:[%s4486_s0 + $0x58] sm:$0xff]  ;;  %v34_v17 = vld [vmem:[%s4489_s3 + $0x20] sm:$0xff] }
   0x7   :  { %v33_v18 = vld [vmem:[%s4489_s3 + $0x18] sm:$0xff]  ;;  %v32_v19 = vld [vmem:[%s4489_s3 + $0x10] sm:$0xff]  ;;  %v54_v20 = vld [vmem:[%s4486_s0 + $0x60] sm:$0xff] }
   0x8   :  { %1484 = vmatpush.msra.mxu1 %v36_v14  ;;  %3003 = vmatpush.msra.mxu2 %v36_v14  ;;  %v31_v21 = vld [vmem:[%s4489_s3 + $0x8] sm:$0xff]  ;;  %v30_v22 = vld [vmem:[%s4489_s3] sm:$0xff]  ;;  %v56_v24 = vld [vmem:[%s4486_s0 + $0x70] sm:$0xff] }
   0x9   :  { %v55_v23 = vld [vmem:[%s4486_s0 + $0x68] sm:$0xff]  ;;  %v57_v25 = vld [vmem:[%s4486_s0 + $0x78] sm:$0xff]  ;;  %v3179_v26 = vld [vmem:[%s4488_s2] ss:$0 sm:$0xff] }
   0xa   :  { %1485 = vmatpush.msra.mxu1 %v35_v15  ;;  %3004 = vmatpush.msra.mxu2 %v35_v15  ;;  %v58_v28 = vld [vmem:[%s4486_s0 + $0x80] sm:$0xff]  ;;  %v120_v31 = vld [vmem:[%s4486_s0 + $0x270] sm:$0xff]  ;;  %v59_v33 = vld [vmem:[%s4486_s0 + $0x88] sm:$0xff] }
   0xb   :  { %2686 = vmatmul.msk.f32.vlgmr.msra.gmra.mxu3 %vm173_vm0, %v120_v31  ;;  %v121_v36 = vld [vmem:[%s4486_s0 + $0x278] sm:$0xff]  ;;  %v60_v38 = vld [vmem:[%s4486_s0 + $0x90] sm:$0xff]  ;;  %v122_v41 = vld [vmem:[%s4486_s0 + $0x280] sm:$0xff] }
   0xc   :  { %1486 = vmatpush.msra.mxu1 %v34_v17  ;;  %3005 = vmatpush.msra.mxu2 %v34_v17  ;;  %v61_v43 = vld [vmem:[%s4486_s0 + $0x98] sm:$0xff]  ;;  %v123_v46 = vld [vmem:[%s4486_s0 + $0x288] sm:$0xff]  ;;  %v62_v48 = vld [vmem:[%s4486_s0 + $0xa0] sm:$0xff] }
   0xd   :  { %2609 = vmatmul.msk.f32.gmra.mxu0 %vm173_vm0, %v43_v3  ;;  %v124_v51 = vld [vmem:[%s4486_s0 + $0x290] sm:$0xff]  ;;  %v63_v53 = vld [vmem:[%s4486_s0 + $0xa8] sm:$0xff]  ;;  %v125_v56 = vld [vmem:[%s4486_s0 + $0x298] sm:$0xff] }
   0xe   :  { %1487 = vmatpush.msra.mxu1 %v33_v18  ;;  %3006 = vmatpush.msra.mxu2 %v33_v18  ;;  %v64_v58 = vld [vmem:[%s4486_s0 + $0xb0] sm:$0xff]  ;;  %v126_v61 = vld [vmem:[%s4486_s0 + $0x2a0] sm:$0xff]  ;;  %v65_v63 = vld [vmem:[%s4486_s0 + $0xb8] sm:$0xff] }
   0xf   :  { %v127_v2 = vld [vmem:[%s4486_s0 + $0x2a8] sm:$0xff]  ;;  %v68_v14 = vld [vmem:[%s4486_s0 + $0xd0] sm:$0xff]  ;;  %v130_v17 = vld [vmem:[%s4486_s0 + $0x2c0] sm:$0xff] }
  0x10   :  { %1488 = vmatpush.msra.mxu1 %v32_v19  ;;  %3007 = vmatpush.msra.mxu2 %v32_v19  ;;  %v69_v19 = vld [vmem:[%s4486_s0 + $0xd8] sm:$0xff] }
  0x12   :  { %1489 = vmatpush.msra.mxu1 %v31_v21  ;;  %3008 = vmatpush.msra.mxu2 %v31_v21 }
  0x13   :  { %2687 = vmatmul.msk.f32.gmra.mxu3 %vm173_vm0, %v121_v36 }
  0x14   :  { %1490 = vmatpush.msra.mxu1 %v30_v22  ;;  %3009 = vmatpush.msra.mxu2 %v30_v22  ;;  %v131_v22 = vld [vmem:[%s4486_s0 + $0x2c8] sm:$0xff] }
  0x15   :  { %2610 = vmatmul.msk.f32.gmra.mxu0 %vm173_vm0, %v44_v4  ;;  %v66_v4 = vld [vmem:[%s4486_s0 + $0xc0] sm:$0xff] }
  0x1b   :  { %2688 = vmatmul.msk.f32.gmra.mxu3 %vm173_vm0, %v122_v41 }
  0x1d   :  { %2611 = vmatmul.msk.f32.gmra.mxu0 %vm173_vm0, %v45_v5 }
  0x23   :  { %2689 = vmatmul.msk.f32.gmra.mxu3 %vm173_vm0, %v123_v46 }
  0x25   :  { %2612 = vmatmul.msk.f32.gmra.mxu0 %vm173_vm0, %v46_v6 }
  0x2b   :  { %2690 = vmatmul.msk.f32.gmra.mxu3 %vm173_vm0, %v124_v51 }
  0x2d   :  { %2613 = vmatmul.msk.f32.gmra.mxu0 %vm173_vm0, %v47_v7  ;;  %v128_v7 = vld [vmem:[%s4486_s0 + $0x2b0] sm:$0xff] }
  0x33   :  { %2691 = vmatmul.msk.f32.gmra.mxu3 %vm173_vm0, %v125_v56 }
  0x35   :  { %2614 = vmatmul.msk.f32.gmra.mxu0 %vm173_vm0, %v48_v8 }
  0x3b   :  { %2692 = vmatmul.msk.f32.gmra.mxu3 %vm173_vm0, %v126_v61  ;;  %v76_v61 = vld [vmem:[%s4486_s0 + $0x110] sm:$0xff] }
  0x3d   :  { %2615 = vmatmul.msk.f32.gmra.mxu0 %vm173_vm0, %v49_v9  ;;  %v67_v9 = vld [vmem:[%s4486_s0 + $0xc8] sm:$0xff] }
  0x43   :  { %2693 = vmatmul.msk.f32.gmra.mxu3 %vm173_vm0, %v127_v2 }
  0x45   :  { %2616 = vmatmul.msk.f32.gmra.mxu0 %vm173_vm0, %v50_v10 }
  0x4b   :  { %2694 = vmatmul.msk.f32.gmra.mxu3 %vm173_vm0, %v128_v7 }
  0x4d   :  { %2617 = vmatmul.msk.f32.gmra.mxu0 %vm173_vm0, %v51_v11 }
  0x55   :  { %2618 = vmatmul.msk.f32.gmra.mxu0 %vm173_vm0, %v52_v12  ;;  %v129_v12 = vld [vmem:[%s4486_s0 + $0x2b8] sm:$0xff] }
  0x56   :  { %2695 = vmatmul.msk.f32.gmra.mxu3 %vm173_vm0, %v129_v12  ;;  %v139_v12 = vld [vmem:[%s4486_s0 + $0x308] sm:$0xff] }
  0x5d   :  { %2619 = vmatmul.msk.f32.gmra.mxu0 %vm173_vm0, %v53_v16 }
  0x5e   :  { %2696 = vmatmul.msk.f32.gmra.mxu3 %vm173_vm0, %v130_v17 }
  0x65   :  { %2620 = vmatmul.msk.f32.gmra.mxu0 %vm173_vm0, %v54_v20 }
  0x66   :  { %2697 = vmatmul.msk.f32.gmra.mxu3 %vm173_vm0, %v131_v22 }
  0x6d   :  { %2621 = vmatmul.msk.f32.gmra.mxu0 %vm173_vm0, %v55_v23 }
  0x75   :  { %2622 = vmatmul.msk.f32.gmra.mxu0 %vm173_vm0, %v56_v24  ;;  %v70_v24 = vld [vmem:[%s4486_s0 + $0xe0] sm:$0xff] }
  0x7d   :  { %2623 = vmatmul.msk.f32.gmra.mxu0 %vm173_vm0, %v57_v25 }
  0x82   :  { %v575_v27 = vpop.f32.mrf.mxu0 }
  0x83   :  { %v576_v29 = vadd.f32 %v3179_v26, %v575_v27 }
  0x85   :  { %v959_v30 = vmax.f32 %v576_v29, 0.0  ;;  %2624 = vmatmul.msk.f32.gmra.mxu0 %vm173_vm0, %v58_v28  ;;  %v132_v28 = vld [vmem:[%s4486_s0 + $0x2d0] sm:$0xff] }
  0x86   :  { %2698 = vmatmul.msk.f32.gmra.mxu3 %vm173_vm0, %v132_v28 }
  0x87   :  { %2736 = vmatmul.msk.f32.vlgmr.msra.gmra.mxu1 %vm1090_vm1, %v959_v30  ;;  %v71_v30 = vld [vmem:[%s4486_s0 + $0xe8] sm:$0xff] }
  0x8a   :  { %v578_v32 = vpop.f32.mrf.mxu0 }
  0x8b   :  { %v579_v34 = vadd.f32 %v3179_v26, %v578_v32 }
  0x8d   :  { %v960_v35 = vmax.f32 %v579_v34, 0.0  ;;  %2625 = vmatmul.msk.f32.gmra.mxu0 %vm173_vm0, %v59_v33  ;;  %v133_v33 = vld [vmem:[%s4486_s0 + $0x2d8] sm:$0xff] }
  0x8e   :  { %2699 = vmatmul.msk.f32.gmra.mxu3 %vm173_vm0, %v133_v33 }
  0x8f   :  { %2737 = vmatmul.msk.f32.gmra.mxu1 %vm1090_vm1, %v960_v35  ;;  %v72_v35 = vld [vmem:[%s4486_s0 + $0xf0] sm:$0xff] }
  0x92   :  { %v581_v37 = vpop.f32.mrf.mxu0 }
  0x93   :  { %v582_v39 = vadd.f32 %v3179_v26, %v581_v37 }
  0x95   :  { %v961_v40 = vmax.f32 %v582_v39, 0.0  ;;  %2626 = vmatmul.msk.f32.gmra.mxu0 %vm173_vm0, %v60_v38  ;;  %v134_v38 = vld [vmem:[%s4486_s0 + $0x2e0] sm:$0xff] }
  0x96   :  { %2700 = vmatmul.msk.f32.gmra.mxu3 %vm173_vm0, %v134_v38 }
  0x97   :  { %2738 = vmatmul.msk.f32.gmra.mxu1 %vm1090_vm1, %v961_v40  ;;  %v73_v40 = vld [vmem:[%s4486_s0 + $0xf8] sm:$0xff] }
  0x9a   :  { %v584_v42 = vpop.f32.mrf.mxu0 }
  0x9b   :  { %v585_v44 = vadd.f32 %v3179_v26, %v584_v42 }
  0x9d   :  { %v962_v45 = vmax.f32 %v585_v44, 0.0  ;;  %2627 = vmatmul.msk.f32.gmra.mxu0 %vm173_vm0, %v61_v43  ;;  %v135_v43 = vld [vmem:[%s4486_s0 + $0x2e8] sm:$0xff] }
  0x9e   :  { %2701 = vmatmul.msk.f32.gmra.mxu3 %vm173_vm0, %v135_v43  ;;  %v81_v43 = vld [vmem:[%s4486_s0 + $0x138] sm:$0xff] }
  0x9f   :  { %2739 = vmatmul.msk.f32.gmra.mxu1 %vm1090_vm1, %v962_v45  ;;  %v74_v45 = vld [vmem:[%s4486_s0 + $0x100] sm:$0xff] }
  0xa2   :  { %v587_v47 = vpop.f32.mrf.mxu0 }
  0xa3   :  { %v588_v49 = vadd.f32 %v3179_v26, %v587_v47 }
  0xa5   :  { %v963_v50 = vmax.f32 %v588_v49, 0.0  ;;  %2628 = vmatmul.msk.f32.gmra.mxu0 %vm173_vm0, %v62_v48  ;;  %v136_v49 = vld [vmem:[%s4486_s0 + $0x2f0] sm:$0xff] }
  0xa6   :  { %2702 = vmatmul.msk.f32.gmra.mxu3 %vm173_vm0, %v136_v49 }
  0xa7   :  { %2740 = vmatmul.msk.f32.gmra.mxu1 %vm1090_vm1, %v963_v50  ;;  %v809_v50 = vpop.f32.mrf.mxu3 }
  0xaa   :  { %v590_v52 = vpop.f32.mrf.mxu0 }
  0xab   :  { %v591_v54 = vadd.f32 %v3179_v26, %v590_v52  ;;  %v75_v52 = vld [vmem:[%s4486_s0 + $0x108] sm:$0xff] }
  0xad   :  { %v964_v55 = vmax.f32 %v591_v54, 0.0  ;;  %2629 = vmatmul.msk.f32.gmra.mxu0 %vm173_vm0, %v63_v53  ;;  %v810_v53 = vadd.f32 %v3179_v26, %v809_v50  ;;  %v143_v50 = vld [vmem:[%s4486_s0 + $0x328] sm:$0xff] }
  0xaf   :  { %2741 = vmatmul.msk.f32.gmra.mxu1 %vm1090_vm1, %v964_v55  ;;  %v1037_v56 = vmax.f32 %v810_v53, 0.0  ;;  %v82_v53 = vld [vmem:[%s4486_s0 + $0x140] sm:$0xff] }
  0xb1   :  { %2814 = vmatmul.msk.f32.vlgmr.msra.gmra.mxu2 %vm1090_vm1, %v1037_v56 }
  0xb2   :  { %v593_v57 = vpop.f32.mrf.mxu0 }
  0xb3   :  { %v594_v59 = vadd.f32 %v3179_v26, %v593_v57 }
  0xb5   :  { %v965_v60 = vmax.f32 %v594_v59, 0.0  ;;  %2630 = vmatmul.msk.f32.gmra.mxu0 %vm173_vm0, %v64_v58  ;;  %v137_v58 = vld [vmem:[%s4486_s0 + $0x2f8] sm:$0xff]  ;;  %v812_v59 = vpop.f32.mrf.mxu3 }
  0xb6   :  { %2703 = vmatmul.msk.f32.gmra.mxu3 %vm173_vm0, %v137_v58 }
  0xb7   :  { %2742 = vmatmul.msk.f32.gmra.mxu1 %vm1090_vm1, %v965_v60 }
  0xba   :  { %v596_v62 = vpop.f32.mrf.mxu0 }
  0xbb   :  { %v597_v0 = vadd.f32 %v3179_v26, %v596_v62  ;;  %v813_v62 = vadd.f32 %v3179_v26, %v812_v59 }
  0xbd   :  { %v966_v1 = vmax.f32 %v597_v0, 0.0  ;;  %2631 = vmatmul.msk.f32.gmra.mxu0 %vm173_vm0, %v65_v63 }
  0xbf   :  { %2743 = vmatmul.msk.f32.gmra.mxu1 %vm1090_vm1, %v966_v1  ;;  %v1038_v1 = vmax.f32 %v813_v62, 0.0 }
  0xc1   :  { %2815 = vmatmul.msk.f32.gmra.mxu2 %vm1090_vm1, %v1038_v1 }
  0xc2   :  { %v599_v3 = vpop.f32.mrf.mxu0 }
  0xc3   :  { %v600_v5 = vadd.f32 %v3179_v26, %v599_v3  ;;  %v138_v3 = vld [vmem:[%s4486_s0 + $0x300] sm:$0xff] }
  0xc4   :  { %2704 = vmatmul.msk.f32.gmra.mxu3 %vm173_vm0, %v138_v3 }
  0xc5   :  { %v967_v6 = vmax.f32 %v600_v5, 0.0  ;;  %2632 = vmatmul.msk.f32.gmra.mxu0 %vm173_vm0, %v66_v4  ;;  %v815_v4 = vpop.f32.mrf.mxu3 }
  0xc6   :  { %v816_v7 = vadd.f32 %v3179_v26, %v815_v4 }
  0xc7   :  { %2744 = vmatmul.msk.f32.gmra.mxu1 %vm1090_vm1, %v967_v6  ;;  %v77_v6 = vld [vmem:[%s4486_s0 + $0x118] sm:$0xff] }
  0xca   :  { %v602_v8 = vpop.f32.mrf.mxu0 }
  0xcb   :  { %v603_v10 = vadd.f32 %v3179_v26, %v602_v8 }
  0xcc   :  { %2705 = vmatmul.msk.f32.gmra.mxu3 %vm173_vm0, %v139_v12 }
  0xcd   :  { %v968_v11 = vmax.f32 %v603_v10, 0.0  ;;  %2633 = vmatmul.msk.f32.gmra.mxu0 %vm173_vm0, %v67_v9  ;;  %v1039_v10 = vmax.f32 %v816_v7, 0.0 }
  0xcf   :  { %2745 = vmatmul.msk.f32.gmra.mxu1 %vm1090_vm1, %v968_v11  ;;  %2816 = vmatmul.msk.f32.gmra.mxu2 %vm1090_vm1, %v1039_v10  ;;  %v84_v10 = vld [vmem:[%s4486_s0 + $0x150] sm:$0xff] }
  0xd2   :  { %v605_v13 = vpop.f32.mrf.mxu0 }
  0xd3   :  { %v606_v15 = vadd.f32 %v3179_v26, %v605_v13  ;;  %v818_v13 = vpop.f32.mrf.mxu3 }
  0xd5   :  { %v969_v16 = vmax.f32 %v606_v15, 0.0  ;;  %2634 = vmatmul.msk.f32.gmra.mxu0 %vm173_vm0, %v68_v14  ;;  %v78_v15 = vld [vmem:[%s4486_s0 + $0x120] sm:$0xff] }
  0xd7   :  { %2746 = vmatmul.msk.f32.gmra.mxu1 %vm1090_vm1, %v969_v16  ;;  %v819_v16 = vadd.f32 %v3179_v26, %v818_v13 }
  0xda   :  { %v608_v18 = vpop.f32.mrf.mxu0 }
  0xdb   :  { %v609_v20 = vadd.f32 %v3179_v26, %v608_v18  ;;  %v821_v22 = vpop.f32.mrf.mxu3 }
  0xdd   :  { %v970_v21 = vmax.f32 %v609_v20, 0.0  ;;  %2635 = vmatmul.msk.f32.gmra.mxu0 %vm173_vm0, %v69_v19  ;;  %v1040_v19 = vmax.f32 %v819_v16, 0.0  ;;  %v146_v16 = vld [vmem:[%s4486_s0 + $0x340] sm:$0xff] }
  0xdf   :  { %2747 = vmatmul.msk.f32.gmra.mxu1 %vm1090_vm1, %v970_v21  ;;  %v140_v21 = vld [vmem:[%s4486_s0 + $0x310] sm:$0xff]  ;;  %2817 = vmatmul.msk.f32.gmra.mxu2 %vm1090_vm1, %v1040_v19 }
  0xe0   :  { %2706 = vmatmul.msk.f32.gmra.mxu3 %vm173_vm0, %v140_v21 }
  0xe2   :  { %v611_v23 = vpop.f32.mrf.mxu0 }
  0xe3   :  { %v612_v25 = vadd.f32 %v3179_v26, %v611_v23 }
  0xe5   :  { %v971_v27 = vmax.f32 %v612_v25, 0.0  ;;  %2636 = vmatmul.msk.f32.gmra.mxu0 %vm173_vm0, %v70_v24  ;;  %v79_v24 = vld [vmem:[%s4486_s0 + $0x128] sm:$0xff]  ;;  %v822_v25 = vadd.f32 %v3179_v26, %v821_v22 }
  0xe7   :  { %2748 = vmatmul.msk.f32.gmra.mxu1 %vm1090_vm1, %v971_v27 }
  0xea   :  { %v614_v29 = vpop.f32.mrf.mxu0 }
  0xeb   :  { %v615_v31 = vadd.f32 %v3179_v26, %v614_v29  ;;  %v1041_v29 = vmax.f32 %v822_v25, 0.0 }
  0xed   :  { %v972_v32 = vmax.f32 %v615_v31, 0.0  ;;  %2637 = vmatmul.msk.f32.gmra.mxu0 %vm173_vm0, %v71_v30  ;;  %v141_v31 = vld [vmem:[%s4486_s0 + $0x318] sm:$0xff]  ;;  %2818 = vmatmul.msk.f32.gmra.mxu2 %vm1090_vm1, %v1041_v29 }
  0xee   :  { %2707 = vmatmul.msk.f32.gmra.mxu3 %vm173_vm0, %v141_v31  ;;  %v86_v31 = vld [vmem:[%s4486_s0 + $0x160] sm:$0xff] }
  0xef   :  { %2749 = vmatmul.msk.f32.gmra.mxu1 %vm1090_vm1, %v972_v32  ;;  %v824_v32 = vpop.f32.mrf.mxu3 }
  0xf2   :  { %v617_v34 = vpop.f32.mrf.mxu0 }
  0xf3   :  { %v618_v36 = vadd.f32 %v3179_v26, %v617_v34  ;;  %v80_v34 = vld [vmem:[%s4486_s0 + $0x130] sm:$0xff] }
  0xf5   :  { %v973_v37 = vmax.f32 %v618_v36, 0.0  ;;  %2638 = vmatmul.msk.f32.gmra.mxu0 %vm173_vm0, %v72_v35  ;;  %v825_v35 = vadd.f32 %v3179_v26, %v824_v32 }
  0xf7   :  { %2750 = vmatmul.msk.f32.gmra.mxu1 %vm1090_vm1, %v973_v37  ;;  %v1042_v38 = vmax.f32 %v825_v35, 0.0 }
  0xf9   :  { %2819 = vmatmul.msk.f32.gmra.mxu2 %vm1090_vm1, %v1042_v38  ;;  %v148_v38 = vld [vmem:[%s4486_s0 + $0x350] sm:$0xff] }
  0xfa   :  { %v620_v39 = vpop.f32.mrf.mxu0 }
  0xfb   :  { %v621_v41 = vadd.f32 %v3179_v26, %v620_v39 }
  0xfd   :  { %v974_v42 = vmax.f32 %v621_v41, 0.0  ;;  %2639 = vmatmul.msk.f32.gmra.mxu0 %vm173_vm0, %v73_v40  ;;  %v142_v40 = vld [vmem:[%s4486_s0 + $0x320] sm:$0xff]  ;;  %v827_v41 = vpop.f32.mrf.mxu3 }
  0xfe   :  { %2708 = vmatmul.msk.f32.gmra.mxu3 %vm173_vm0, %v142_v40 }
  0xff   :  { %2751 = vmatmul.msk.f32.gmra.mxu1 %vm1090_vm1, %v974_v42 }
 0x102   :  { %v623_v44 = vpop.f32.mrf.mxu0 }
 0x103   :  { %v624_v46 = vadd.f32 %v3179_v26, %v623_v44  ;;  %v828_v44 = vadd.f32 %v3179_v26, %v827_v41  ;;  %v87_v41 = vld [vmem:[%s4486_s0 + $0x168] sm:$0xff] }
 0x104   :  { %v3345_v47 = vpop.f32.mrf.mxu1 }
 0x105   :  { %v975_v48 = vmax.f32 %v624_v46, 0.0  ;;  %2640 = vmatmul.msk.f32.gmra.mxu0 %vm173_vm0, %v74_v45 }
 0x106   :  { %2709 = vmatmul.msk.f32.gmra.mxu3 %vm173_vm0, %v143_v50 }
 0x107   :  { %2752 = vmatmul.msk.f32.gmra.mxu1 %vm1090_vm1, %v975_v48  ;;  %v1043_v48 = vmax.f32 %v828_v44, 0.0 }
 0x109   :  { %2820 = vmatmul.msk.f32.gmra.mxu2 %vm1090_vm1, %v1043_v48 }
 0x10a   :  { %v626_v51 = vpop.f32.mrf.mxu0 }
 0x10b   :  { %v627_v54 = vadd.f32 %v3179_v26, %v626_v51  ;;  %v830_v51 = vpop.f32.mrf.mxu3 }
 0x10c   :  { %v3358_v55 = vpop.f32.mrf.mxu1 }
 0x10d   :  { %v976_v57 = vmax.f32 %v627_v54, 0.0  ;;  %2641 = vmatmul.msk.f32.gmra.mxu0 %vm173_vm0, %v75_v52  ;;  %v831_v54 = vadd.f32 %v3179_v26, %v830_v51 }
 0x10f   :  { %2753 = vmatmul.msk.f32.gmra.mxu1 %vm1090_vm1, %v976_v57  ;;  %v1044_v58 = vmax.f32 %v831_v54, 0.0 }
 0x111   :  { %2821 = vmatmul.msk.f32.gmra.mxu2 %vm1090_vm1, %v1044_v58 }
 0x112   :  { %v629_v60 = vpop.f32.mrf.mxu0 }
 0x113   :  { %v630_v63 = vadd.f32 %v3179_v26, %v629_v60  ;;  %v144_v60 = vld [vmem:[%s4486_s0 + $0x330] sm:$0xff] }
 0x114   :  { %v3372_v0 = vpop.f32.mrf.mxu1  ;;  %2710 = vmatmul.msk.f32.gmra.mxu3 %vm173_vm0, %v144_v60  ;;  %v150_v60 = vld [vmem:[%s4486_s0 + $0x360] sm:$0xff] }
 0x115   :  { %v977_v2 = vmax.f32 %v630_v63, 0.0  ;;  %2642 = vmatmul.msk.f32.gmra.mxu0 %vm173_vm0, %v76_v61  ;;  %v833_v61 = vpop.f32.mrf.mxu3  ;;  %v83_v63 = vld [vmem:[%s4486_s0 + $0x148] sm:$0xff] }
 0x116   :  { %v834_v1 = vadd.f32 %v3179_v26, %v833_v61 }
 0x117   :  { %2754 = vmatmul.msk.f32.gmra.mxu1 %vm1090_vm1, %v977_v2 }
 0x118   :  { %v1045_v4 = vmax.f32 %v834_v1, 0.0 }
 0x11a   :  { %v632_v5 = vpop.f32.mrf.mxu0  ;;  %2822 = vmatmul.msk.f32.gmra.mxu2 %vm1090_vm1, %v1045_v4 }
 0x11b   :  { %v633_v8 = vadd.f32 %v3179_v26, %v632_v5 }
 0x11c   :  { %v3386_v9 = vpop.f32.mrf.mxu1 }
 0x11d   :  { %v978_v11 = vmax.f32 %v633_v8, 0.0  ;;  %2643 = vmatmul.msk.f32.gmra.mxu0 %vm173_vm0, %v77_v6  ;;  %v145_v6 = vld [vmem:[%s4486_s0 + $0x338] sm:$0xff]  ;;  %v836_v7 = vpop.f32.mrf.mxu3 }
 0x11e   :  { %2711 = vmatmul.msk.f32.gmra.mxu3 %vm173_vm0, %v145_v6 }
 0x11f   :  { %2755 = vmatmul.msk.f32.gmra.mxu1 %vm1090_vm1, %v978_v11  ;;  %v837_v11 = vadd.f32 %v3179_v26, %v836_v7 }
 0x122   :  { %v635_v14 = vpop.f32.mrf.mxu0 }
 0x123   :  { %v636_v17 = vadd.f32 %v3179_v26, %v635_v14  ;;  %v1046_v14 = vmax.f32 %v837_v11, 0.0 }
 0x124   :  { %v3400_v18 = vpop.f32.mrf.mxu1 }
 0x125   :  { %v979_v20 = vmax.f32 %v636_v17, 0.0  ;;  %2644 = vmatmul.msk.f32.gmra.mxu0 %vm173_vm0, %v78_v15  ;;  %2823 = vmatmul.msk.f32.gmra.mxu2 %vm1090_vm1, %v1046_v14  ;;  %v839_v17 = vpop.f32.mrf.mxu3 }
 0x126   :  { %2712 = vmatmul.msk.f32.gmra.mxu3 %vm173_vm0, %v146_v16  ;;  %v840_v21 = vadd.f32 %v3179_v26, %v839_v17  ;;  %v90_v16 = vld [vmem:[%s4486_s0 + $0x180] sm:$0xff] }
 0x127   :  { %2756 = vmatmul.msk.f32.gmra.mxu1 %vm1090_vm1, %v979_v20  ;;  %v85_v20 = vld [vmem:[%s4486_s0 + $0x158] sm:$0xff] }
 0x12a   :  { %v638_v23 = vpop.f32.mrf.mxu0 }
 0x12b   :  { %v639_v27 = vadd.f32 %v3179_v26, %v638_v23 }
 0x12c   :  { %v3414_v28 = vpop.f32.mrf.mxu1 }
 0x12d   :  { %v980_v30 = vmax.f32 %v639_v27, 0.0  ;;  %2645 = vmatmul.msk.f32.gmra.mxu0 %vm173_vm0, %v79_v24  ;;  %v1047_v24 = vmax.f32 %v840_v21, 0.0  ;;  %v147_v27 = vld [vmem:[%s4486_s0 + $0x348] sm:$0xff]  ;;  %v842_v29 = vpop.f32.mrf.mxu3 }
 0x12e   :  { %2713 = vmatmul.msk.f32.gmra.mxu3 %vm173_vm0, %v147_v27  ;;  %v843_v32 = vadd.f32 %v3179_v26, %v842_v29  ;;  %v152_v27 = vld [vmem:[%s4486_s0 + $0x370] sm:$0xff] }
 0x12f   :  { %2757 = vmatmul.msk.f32.gmra.mxu1 %vm1090_vm1, %v980_v30  ;;  %2824 = vmatmul.msk.f32.gmra.mxu2 %vm1090_vm1, %v1047_v24 }
 0x130   :  { %v1048_v35 = vmax.f32 %v843_v32, 0.0 }
 0x132   :  { %v641_v33 = vpop.f32.mrf.mxu0 }
 0x133   :  { %v642_v36 = vadd.f32 %v3179_v26, %v641_v33 }
 0x134   :  { %v3428_v37 = vpop.f32.mrf.mxu1 }
 0x135   :  { %v981_v39 = vmax.f32 %v642_v36, 0.0  ;;  %2646 = vmatmul.msk.f32.gmra.mxu0 %vm173_vm0, %v80_v34 }
 0x136   :  { %2714 = vmatmul.msk.f32.gmra.mxu3 %vm173_vm0, %v148_v38 }
 0x137   :  { %2758 = vmatmul.msk.f32.gmra.mxu1 %vm1090_vm1, %v981_v39  ;;  %2825 = vmatmul.msk.f32.gmra.mxu2 %vm1090_vm1, %v1048_v35  ;;  %v845_v39 = vpop.f32.mrf.mxu3 }
 0x13a   :  { %v644_v42 = vpop.f32.mrf.mxu0 }
 0x13b   :  { %v645_v45 = vadd.f32 %v3179_v26, %v644_v42  ;;  %v846_v42 = vadd.f32 %v3179_v26, %v845_v39 }
 0x13c   :  { %v3442_v46 = vpop.f32.mrf.mxu1 }
 0x13d   :  { %v982_v49 = vmax.f32 %v645_v45, 0.0  ;;  %2647 = vmatmul.msk.f32.gmra.mxu0 %vm173_vm0, %v81_v43  ;;  %v1049_v45 = vmax.f32 %v846_v42, 0.0  ;;  %v153_v42 = vld [vmem:[%s4486_s0 + $0x378] sm:$0xff] }
 0x13f   :  { %2759 = vmatmul.msk.f32.gmra.mxu1 %vm1090_vm1, %v982_v49  ;;  %v149_v49 = vld [vmem:[%s4486_s0 + $0x358] sm:$0xff]  ;;  %2826 = vmatmul.msk.f32.gmra.mxu2 %vm1090_vm1, %v1049_v45  ;;  %v848_v50 = vpop.f32.mrf.mxu3 }
 0x140   :  { %2715 = vmatmul.msk.f32.gmra.mxu3 %vm173_vm0, %v149_v49 }
 0x142   :  { %v647_v52 = vpop.f32.mrf.mxu0 }
 0x143   :  { %v648_v56 = vadd.f32 %v3179_v26, %v647_v52  ;;  %v88_v52 = vld [vmem:[%s4486_s0 + $0x170] sm:$0xff] }
 0x144   :  { %v3456_v57 = vpop.f32.mrf.mxu1 }
 0x145   :  { %v983_v59 = vmax.f32 %v648_v56, 0.0  ;;  %2648 = vmatmul.msk.f32.gmra.mxu0 %vm173_vm0, %v82_v53  ;;  %v849_v53 = vadd.f32 %v3179_v26, %v848_v50 }
 0x147   :  { %2760 = vmatmul.msk.f32.gmra.mxu1 %vm1090_vm1, %v983_v59  ;;  %v1050_v58 = vmax.f32 %v849_v53, 0.0  ;;  %v851_v61 = vpop.f32.mrf.mxu3 }
 0x148   :  { %2716 = vmatmul.msk.f32.gmra.mxu3 %vm173_vm0, %v150_v60  ;;  %v852_v1 = vadd.f32 %v3179_v26, %v851_v61  ;;  %v93_v61 = vld [vmem:[%s4486_s0 + $0x198] sm:$0xff] }
 0x149   :  { %2827 = vmatmul.msk.f32.gmra.mxu2 %vm1090_vm1, %v1050_v58 }
 0x14a   :  { %v650_v62 = vpop.f32.mrf.mxu0  ;;  %v1051_v6 = vmax.f32 %v852_v1, 0.0 }
 0x14b   :  { %v651_v2 = vadd.f32 %v3179_v26, %v650_v62 }
 0x14c   :  { %v3470_v3 = vpop.f32.mrf.mxu1 }
 0x14d   :  { %v984_v5 = vmax.f32 %v651_v2, 0.0  ;;  %2649 = vmatmul.msk.f32.gmra.mxu0 %vm173_vm0, %v83_v63  ;;  %v89_v63 = vld [vmem:[%s4486_s0 + $0x178] sm:$0xff]  ;;  %v3552_v2 = vld [vmem:[%s4490_s4] ss:$0 sm:$0xff] }
 0x14e   :  { %v1520_v50 = vadd.f32 %v3552_v2, %v3470_v3  ;;  %v1517_v3 = vadd.f32 %v3552_v2, %v3456_v57 }
 0x14f   :  { %2761 = vmatmul.msk.f32.gmra.mxu1 %vm1090_vm1, %v984_v5  ;;  %v854_v14 = vpop.f32.mrf.mxu3 }
 0x150   :  { %v855_v17 = vadd.f32 %v3179_v26, %v854_v14  ;;  %v1885_v58 = vmax.f32 %v1520_v50, 0.0  ;;  %v1884_v1 = vmax.f32 %v1517_v3, 0.0  ;;  %v158_v50 = vld [vmem:[%s4486_s0 + $0x3a0] sm:$0xff] }
 0x151   :  { %2828 = vmatmul.msk.f32.gmra.mxu2 %vm1090_vm1, %v1051_v6 }
 0x152   :  { %v653_v8 = vpop.f32.mrf.mxu0  ;;  %v1052_v24 = vmax.f32 %v855_v17, 0.0 }
 0x153   :  { %v654_v12 = vadd.f32 %v3179_v26, %v653_v8 }
 0x154   :  { %v3484_v13 = vpop.f32.mrf.mxu1 }
 0x155   :  { %v985_v15 = vmax.f32 %v654_v12, 0.0  ;;  %2650 = vmatmul.msk.f32.gmra.mxu0 %vm173_vm0, %v84_v10  ;;  %v151_v10 = vld [vmem:[%s4486_s0 + $0x368] sm:$0xff] }
 0x156   :  { %2717 = vmatmul.msk.f32.gmra.mxu3 %vm173_vm0, %v151_v10 }
 0x157   :  { %2762 = vmatmul.msk.f32.gmra.mxu1 %vm1090_vm1, %v985_v15 }
 0x159   :  { %2829 = vmatmul.msk.f32.gmra.mxu2 %vm1090_vm1, %v1052_v24 }
 0x15a   :  { %v656_v19 = vpop.f32.mrf.mxu0 }
 0x15b   :  { %v657_v22 = vadd.f32 %v3179_v26, %v656_v19 }
 0x15c   :  { %v3498_v23 = vpop.f32.mrf.mxu1 }
 0x15d   :  { %v986_v25 = vmax.f32 %v657_v22, 0.0  ;;  %2651 = vmatmul.msk.f32.gmra.mxu0 %vm173_vm0, %v85_v20 }
 0x15e   :  { %2718 = vmatmul.msk.f32.gmra.mxu3 %vm173_vm0, %v152_v27 }
 0x15f   :  { %2763 = vmatmul.msk.f32.gmra.mxu1 %vm1090_vm1, %v986_v25 }
 0x162   :  { %v659_v30 = vpop.f32.mrf.mxu0 }
 0x163   :  { %v660_v33 = vadd.f32 %v3179_v26, %v659_v30 }
 0x164   :  { %v3512_v34 = vpop.f32.mrf.mxu1 }
 0x165   :  { %v987_v36 = vmax.f32 %v660_v33, 0.0  ;;  %2652 = vmatmul.msk.f32.gmra.mxu0 %vm173_vm0, %v86_v31  ;;  %v1529_v29 = vadd.f32 %v3552_v2, %v3512_v34  ;;  %v857_v31 = vpop.f32.mrf.mxu3  ;;  %v91_v33 = vld [vmem:[%s4486_s0 + $0x188] sm:$0xff] }
 0x166   :  { %v858_v35 = vadd.f32 %v3179_v26, %v857_v31  ;;  %2719 = vmatmul.msk.f32.gmra.mxu3 %vm173_vm0, %v153_v42  ;;  %v1502_v31 = vadd.f32 %v3552_v2, %v3386_v9  ;;  %v1499_v9 = vadd.f32 %v3552_v2, %v3372_v0  ;;  %v96_v42 = vld [vmem:[%s4486_s0 + $0x1b0] sm:$0xff] }
 0x167   :  { %2764 = vmatmul.msk.f32.gmra.mxu1 %vm1090_vm1, %v987_v36  ;;  %v1526_v36 = vadd.f32 %v3552_v2, %v3498_v23  ;;  %v1888_v38 = vmax.f32 %v1529_v29, 0.0  ;;  %v1523_v23 = vadd.f32 %v3552_v2, %v3484_v13  ;;  %v95_v29 = vld [vmem:[%s4486_s0 + $0x1a8] sm:$0xff] }
 0x16a   :  { %v662_v40 = vpop.f32.mrf.mxu0 }
 0x16b   :  { %v663_v43 = vadd.f32 %v3179_v26, %v662_v40  ;;  %v1053_v40 = vmax.f32 %v858_v35, 0.0 }
 0x16c   :  { %v1531_v44 = vpop.f32.mrf.mxu1 }
 0x16d   :  { %v988_v48 = vmax.f32 %v663_v43, 0.0  ;;  %2653 = vmatmul.msk.f32.gmra.mxu0 %vm173_vm0, %v87_v41  ;;  %v1532_v19 = vadd.f32 %v3552_v2, %v1531_v44  ;;  %2830 = vmatmul.msk.f32.gmra.mxu2 %vm1090_vm1, %v1053_v40  ;;  %v1887_v43 = vmax.f32 %v1526_v36, 0.0  ;;  %v860_v44 = vpop.f32.mrf.mxu3 }
 0x16e   :  { %v861_v49 = vadd.f32 %v3179_v26, %v860_v44  ;;  %v1878_v44 = vmax.f32 %v1499_v9, 0.0  ;;  %v101_v9 = vld [vmem:[%s4486_s0 + $0x1d8] sm:$0xff] }
 0x16f   :  { %2765 = vmatmul.msk.f32.gmra.mxu1 %vm1090_vm1, %v988_v48  ;;  %v1889_v30 = vmax.f32 %v1532_v19, 0.0  ;;  %v92_v48 = vld [vmem:[%s4486_s0 + $0x190] sm:$0xff] }
 0x170   :  { %v1054_v53 = vmax.f32 %v861_v49, 0.0 }
 0x172   :  { %v665_v51 = vpop.f32.mrf.mxu0 }
 0x173   :  { %v666_v54 = vadd.f32 %v3179_v26, %v665_v51  ;;  %v1886_v51 = vmax.f32 %v1523_v23, 0.0 }
 0x174   :  { %v1534_v56 = vpop.f32.mrf.mxu1 }
 0x175   :  { %v989_v59 = vmax.f32 %v666_v54, 0.0  ;;  %2654 = vmatmul.msk.f32.gmra.mxu0 %vm173_vm0, %v88_v52  ;;  %v1535_v11 = vadd.f32 %v3552_v2, %v1534_v56  ;;  %v154_v56 = vld [vmem:[%s4486_s0 + $0x380] sm:$0xff]  ;;  %2831 = vmatmul.msk.f32.gmra.mxu2 %vm1090_vm1, %v1054_v53 }
 0x176   :  { %2720 = vmatmul.msk.f32.gmra.mxu3 %vm173_vm0, %v154_v56 }
 0x177   :  { %2766 = vmatmul.msk.f32.gmra.mxu1 %vm1090_vm1, %v989_v59  ;;  %v1890_v20 = vmax.f32 %v1535_v11, 0.0  ;;  %v863_v59 = vpop.f32.mrf.mxu3 }
 0x17a   :  { %v668_v62 = vpop.f32.mrf.mxu0 }
 0x17b   :  { %v669_v4 = vadd.f32 %v3179_v26, %v668_v62  ;;  %v864_v62 = vadd.f32 %v3179_v26, %v863_v59 }
 0x17c   :  { %v1537_v5 = vpop.f32.mrf.mxu1 }
 0x17d   :  { %v990_v7 = vmax.f32 %v669_v4, 0.0  ;;  %v1538_v8 = vadd.f32 %v3552_v2, %v1537_v5  ;;  %2655 = vmatmul.msk.f32.gmra.mxu0 %vm173_vm0, %v89_v63  ;;  %v1514_v63 = vadd.f32 %v3552_v2, %v3442_v46  ;;  %v1055_v5 = vmax.f32 %v864_v62, 0.0 }
 0x17e   :  { %v1511_v46 = vadd.f32 %v3552_v2, %v3428_v37 }
 0x17f   :  { %v1891_v12 = vmax.f32 %v1538_v8, 0.0  ;;  %2767 = vmatmul.msk.f32.gmra.mxu1 %vm1090_vm1, %v990_v7  ;;  %v155_v7 = vld [vmem:[%s4486_s0 + $0x388] sm:$0xff]  ;;  %2832 = vmatmul.msk.f32.gmra.mxu2 %vm1090_vm1, %v1055_v5  ;;  %v1883_v8 = vmax.f32 %v1514_v63, 0.0  ;;  %v866_v10 = vpop.f32.mrf.mxu3 }
 0x180   :  { %2721 = vmatmul.msk.f32.gmra.mxu3 %vm173_vm0, %v155_v7  ;;  %v867_v14 = vadd.f32 %v3179_v26, %v866_v10 }
 0x181   :  { %2864 = vmatpush.xpose.msk.msrb.mxu2 %vm2004_vm2, %v1891_v12  ;;  %v94_v12 = vld [vmem:[%s4486_s0 + $0x1a0] sm:$0xff] }
 0x182   :  { %v671_v15 = vpop.f32.mrf.mxu0  ;;  %v1056_v19 = vmax.f32 %v867_v14, 0.0 }
 0x183   :  { %v672_v21 = vadd.f32 %v3179_v26, %v671_v15  ;;  %v1508_v15 = vadd.f32 %v3552_v2, %v3414_v28  ;;  %v1505_v28 = vadd.f32 %v3552_v2, %v3400_v18 }
 0x184   :  { %v3571_v22 = vpop.f32.mrf.mxu1 }
 0x185   :  { %v991_v25 = vmax.f32 %v672_v21, 0.0  ;;  %2656 = vmatmul.msk.f32.gmra.mxu0 %vm173_vm0, %v90_v16  ;;  %2865 = vmatpush.xpose.msk.msrb.mxu2 %vm2004_vm2, %v1890_v20  ;;  %v1882_v16 = vmax.f32 %v1511_v46, 0.0  ;;  %v156_v21 = vld [vmem:[%s4486_s0 + $0x390] sm:$0xff]  ;;  %v1881_v24 = vmax.f32 %v1508_v15, 0.0 }
 0x187   :  { %2768 = vmatmul.msk.f32.gmra.mxu1 %vm1090_vm1, %v991_v25  ;;  %2833 = vmatmul.msk.f32.gmra.mxu2 %vm1090_vm1, %v1056_v19  ;;  %v869_v25 = vpop.f32.mrf.mxu3 }
 0x188   :  { %2722 = vmatmul.msk.f32.gmra.mxu3 %vm173_vm0, %v156_v21  ;;  %v3745_v21 = vpop.f32.mrf.mxu2 }
 0x189   :  { %2866 = vmatpush.xpose.msk.msrb.mxu2 %vm2004_vm2, %v1889_v30  ;;  %v870_v30 = vadd.f32 %v3179_v26, %v869_v25  ;;  %v3755_v25 = vld [vmem:[%s4488_s2] ss:$0 sm:$0xff] }
 0x18a   :  { %v674_v32 = vpop.f32.mrf.mxu0 }
 0x18b   :  { %v675_v39 = vadd.f32 %v3179_v26, %v674_v32  ;;  %v1880_v32 = vmax.f32 %v1505_v28, 0.0  ;;  %v1057_v35 = vmax.f32 %v870_v30, 0.0 }
 0x18c   :  { %v3591_v34 = vpop.f32.mrf.mxu1 }
 0x18d   :  { %v992_v41 = vmax.f32 %v675_v39, 0.0  ;;  %2657 = vmatmul.msk.f32.gmra.mxu0 %vm173_vm0, %v91_v33  ;;  %2867 = vmatpush.xpose.msk.msrb.mxu2 %vm2004_vm2, %v1888_v38  ;;  %v157_v38 = vld [vmem:[%s4486_s0 + $0x398] sm:$0xff]  ;;  %v1879_v39 = vmax.f32 %v1502_v31, 0.0 }
 0x18f   :  { %2769 = vmatmul.msk.f32.gmra.mxu1 %vm1090_vm1, %v992_v41  ;;  %2834 = vmatmul.msk.f32.gmra.mxu2 %vm1090_vm1, %v1057_v35  ;;  %v872_v40 = vpop.f32.mrf.mxu3 }
 0x190   :  { %2723 = vmatmul.msk.f32.gmra.mxu3 %vm173_vm0, %v157_v38  ;;  %v873_v23 = vadd.f32 %v3179_v26, %v872_v40  ;;  %v3766_v35 = vpop.f32.mrf.mxu2 }
 0x191   :  { %2868 = vmatpush.xpose.msk.msrb.mxu2 %vm2004_vm2, %v1887_v43  ;;  %v1496_v43 = vadd.f32 %v3552_v2, %v3358_v55  ;;  %v1493_v55 = vadd.f32 %v3552_v2, %v3345_v47 }
 0x192   :  { %v677_v45 = vpop.f32.mrf.mxu0 }
 0x193   :  { %v678_v52 = vadd.f32 %v3179_v26, %v677_v45  ;;  %v1876_v3 = vmax.f32 %v1493_v55, 0.0 }
 0x194   :  { %v3611_v13 = vpop.f32.mrf.mxu1 }
 0x195   :  { %v993_v54 = vmax.f32 %v678_v52, 0.0  ;;  %2658 = vmatmul.msk.f32.gmra.mxu0 %vm173_vm0, %v92_v48  ;;  %2869 = vmatpush.xpose.msk.msrb.mxu2 %vm2004_vm2, %v1886_v51  ;;  %v1058_v48 = vmax.f32 %v873_v23, 0.0  ;;  %v1877_v51 = vmax.f32 %v1496_v43, 0.0  ;;  %v163_v43 = vld [vmem:[%s4486_s0 + $0x3c8] sm:$0xff] }
 0x197   :  { %2770 = vmatmul.msk.f32.gmra.mxu1 %vm1090_vm1, %v993_v54  ;;  %2835 = vmatmul.msk.f32.gmra.mxu2 %vm1090_vm1, %v1058_v48  ;;  %v875_v52 = vpop.f32.mrf.mxu3  ;;  %v97_v54 = vld [vmem:[%s4486_s0 + $0x1b8] sm:$0xff] }
 0x198   :  { %2724 = vmatmul.msk.f32.gmra.mxu3 %vm173_vm0, %v158_v50  ;;  %v876_v56 = vadd.f32 %v3179_v26, %v875_v52 }
 0x199   :  { %2870 = vmatpush.xpose.msk.msrb.mxu2 %vm2004_vm2, %v1885_v58 }
 0x19a   :  { %v680_v60 = vpop.f32.mrf.mxu0 }
 0x19b   :  { %v681_v4 = vadd.f32 %v3179_v26, %v680_v60  ;;  %v1059_v60 = vmax.f32 %v876_v56, 0.0 }
 0x19c   :  { %v3631_v57 = vpop.f32.mrf.mxu1 }
 0x19d   :  { %v994_v6 = vmax.f32 %v681_v4, 0.0  ;;  %2659 = vmatmul.msk.f32.gmra.mxu0 %vm173_vm0, %v93_v61  ;;  %2871 = vmatpush.xpose.msk.msrb.mxu2 %vm2004_vm2, %v1884_v1  ;;  %v159_v61 = vld [vmem:[%s4486_s0 + $0x3a8] sm:$0xff]  ;;  %v98_v1 = vld [vmem:[%s4486_s0 + $0x1c0] sm:$0xff] }
 0x19f   :  { %2771 = vmatmul.msk.f32.gmra.mxu1 %vm1090_vm1, %v994_v6  ;;  %2836 = vmatmul.msk.f32.gmra.mxu2 %vm1090_vm1, %v1059_v60  ;;  %v878_v62 = vpop.f32.mrf.mxu3  ;;  %v103_v60 = vld [vmem:[%s4486_s0 + $0x1e8] sm:$0xff] }
 0x1a0   :  { %2725 = vmatmul.msk.f32.gmra.mxu3 %vm173_vm0, %v159_v61  ;;  %v879_v4 = vadd.f32 %v3179_v26, %v878_v62 }
 0x1a1   :  { %2872 = vmatpush.xpose.msk.msrb.mxu2 %vm2004_vm2, %v1883_v8  ;;  %v160_v8 = vld [vmem:[%s4486_s0 + $0x3b0] sm:$0xff] }
 0x1a2   :  { %v683_v11 = vpop.f32.mrf.mxu0  ;;  %v1060_v7 = vmax.f32 %v879_v4, 0.0  ;;  %v165_v4 = vld [vmem:[%s4486_s0 + $0x3d8] sm:$0xff] }
 0x1a3   :  { %v684_v17 = vadd.f32 %v3179_v26, %v683_v11 }
 0x1a4   :  { %v3651_v37 = vpop.f32.mrf.mxu1 }
 0x1a5   :  { %v995_v20 = vmax.f32 %v684_v17, 0.0  ;;  %2660 = vmatmul.msk.f32.gmra.mxu0 %vm173_vm0, %v94_v12  ;;  %2873 = vmatpush.xpose.msk.msrb.mxu2 %vm2004_vm2, %v1882_v16  ;;  %v99_v12 = vld [vmem:[%s4486_s0 + $0x1c8] sm:$0xff] }
 0x1a7   :  { %2772 = vmatmul.msk.f32.gmra.mxu1 %vm1090_vm1, %v995_v20  ;;  %2837 = vmatmul.msk.f32.gmra.mxu2 %vm1090_vm1, %v1060_v7  ;;  %v881_v10 = vpop.f32.mrf.mxu3  ;;  %v161_v20 = vld [vmem:[%s4486_s0 + $0x3b8] sm:$0xff] }
 0x1a8   :  { %2726 = vmatmul.msk.f32.gmra.mxu3 %vm173_vm0, %v160_v8  ;;  %v882_v14 = vadd.f32 %v3179_v26, %v881_v10  ;;  %v104_v8 = vld [vmem:[%s4486_s0 + $0x1f0] sm:$0xff] }
 0x1a9   :  { %2874 = vmatpush.xpose.msk.msrb.mxu2 %vm2004_vm2, %v1881_v24  ;;  %v100_v24 = vld [vmem:[%s4486_s0 + $0x1d0] sm:$0xff] }
 0x1aa   :  { %v686_v27 = vpop.f32.mrf.mxu0  ;;  %v1061_v17 = vmax.f32 %v882_v14, 0.0 }
 0x1ab   :  { %v687_v33 = vadd.f32 %v3179_v26, %v686_v27 }
 0x1ac   :  { %v3671_v18 = vpop.f32.mrf.mxu1 }
 0x1ad   :  { %v996_v36 = vmax.f32 %v687_v33, 0.0  ;;  %2661 = vmatmul.msk.f32.gmra.mxu0 %vm173_vm0, %v95_v29  ;;  %2875 = vmatpush.xpose.msk.msrb.mxu2 %vm2004_vm2, %v1880_v32  ;;  %v162_v33 = vld [vmem:[%s4486_s0 + $0x3c0] sm:$0xff] }
 0x1af   :  { %2773 = vmatmul.msk.f32.gmra.mxu1 %vm1090_vm1, %v996_v36  ;;  %2838 = vmatmul.msk.f32.gmra.mxu2 %vm1090_vm1, %v1061_v17  ;;  %v884_v28 = vpop.f32.mrf.mxu3  ;;  %v166_v17 = vld [vmem:[%s4486_s0 + $0x3e0] sm:$0xff] }
 0x1b0   :  { %2727 = vmatmul.msk.f32.gmra.mxu3 %vm173_vm0, %v161_v20  ;;  %v885_v27 = vadd.f32 %v3755_v25, %v884_v28 }
 0x1b1   :  { %2876 = vmatpush.xpose.msk.msrb.mxu2 %vm2004_vm2, %v1879_v39 }
 0x1b2   :  { %v689_v41 = vpop.f32.mrf.mxu0  ;;  %v1062_v31 = vmax.f32 %v885_v27, 0.0 }
 0x1b3   :  { %v690_v45 = vadd.f32 %v3179_v26, %v689_v41 }
 0x1b4   :  { %v3691_v0 = vpop.f32.mrf.mxu1 }
 0x1b5   :  { %v997_v49 = vmax.f32 %v690_v45, 0.0  ;;  %2662 = vmatmul.msk.f32.gmra.mxu0 %vm173_vm0, %v96_v42  ;;  %2877 = vmatpush.xpose.msk.msrb.mxu2 %vm2004_vm2, %v1878_v44  ;;  %v3782_v44 = vpop.f32.mrf.mxu2 }
 0x1b7   :  { %2774 = vmatmul.msk.f32.gmra.mxu1 %vm1090_vm1, %v997_v49  ;;  %2839 = vmatmul.msk.f32.gmra.mxu2 %vm1090_vm1, %v1062_v31  ;;  %v887_v36 = vpop.f32.mrf.mxu3  ;;  %v102_v49 = vld [vmem:[%s4486_s0 + $0x1e0] sm:$0xff] }
 0x1b8   :  { %2728 = vmatmul.msk.f32.gmra.mxu3 %vm173_vm0, %v162_v33  ;;  %v888_v39 = vadd.f32 %v3755_v25, %v887_v36  ;;  %v167_v36 = vld [vmem:[%s4486_s0 + $0x3e8] sm:$0xff] }
 0x1b9   :  { %2878 = vmatpush.xpose.msk.msrb.mxu2 %vm2004_vm2, %v1877_v51 }
 0x1ba   :  { %v692_v53 = vpop.f32.mrf.mxu0  ;;  %v1063_v42 = vmax.f32 %v888_v39, 0.0 }
 0x1bb   :  { %v693_v58 = vadd.f32 %v3179_v26, %v692_v53 }
 0x1bc   :  { %v3709_v59 = vpop.f32.mrf.mxu1 }
 0x1bd   :  { %v998_v47 = vmax.f32 %v693_v58, 0.0  ;;  %2663 = vmatmul.msk.f32.gmra.mxu0 %vm173_vm0, %v97_v54  ;;  %2879 = vmatpush.xpose.msk.msrb.mxu2 %vm2004_vm2, %v1876_v3  ;;  %v164_v54 = vld [vmem:[%s4486_s0 + $0x3d0] sm:$0xff]  ;;  %v3798_v56 = vpop.f32.mrf.mxu2 }
 0x1bf   :  { %2775 = vmatmul.msk.f32.gmra.mxu1 %vm1090_vm1, %v998_v47  ;;  %2840 = vmatmul.msk.f32.gmra.mxu2 %vm1090_vm1, %v1063_v42  ;;  %v890_v45 = vpop.f32.mrf.mxu3 }
 0x1c0   :  { %2729 = vmatmul.msk.f32.gmra.mxu3 %vm173_vm0, %v163_v43  ;;  %v891_v50 = vadd.f32 %v3755_v25, %v890_v45 }
 0x1c2   :  { %v695_v63 = vpop.f32.mrf.mxu0  ;;  %v1064_v52 = vmax.f32 %v891_v50, 0.0 }
 0x1c3   :  { %v696_v5 = vadd.f32 %v3179_v26, %v695_v63 }
 0x1c4   :  { %v3724_v6 = vpop.f32.mrf.mxu1 }
 0x1c5   :  { %v999_v46 = vmax.f32 %v696_v5, 0.0  ;;  %2664 = vmatmul.msk.f32.gmra.mxu0 %vm173_vm0, %v98_v1  ;;  %v3812_v5 = vpop.f32.mrf.mxu2 }
 0x1c7   :  { %2776 = vmatmul.msk.f32.gmra.mxu1 %vm1090_vm1, %v999_v46  ;;  %2841 = vmatmul.msk.f32.gmra.mxu2 %vm1090_vm1, %v1064_v52  ;;  %v893_v3 = vpop.f32.mrf.mxu3 }
 0x1c8   :  { %2730 = vmatmul.msk.f32.gmra.mxu3 %vm173_vm0, %v164_v54  ;;  %v894_v47 = vadd.f32 %v3755_v25, %v893_v3 }
 0x1ca   :  { %v698_v11 = vpop.f32.mrf.mxu0  ;;  %v1065_v63 = vmax.f32 %v894_v47, 0.0 }
 0x1cb   :  { %v699_v15 = vadd.f32 %v3179_v26, %v698_v11 }
 0x1cc   :  { %v3738_v16 = vpop.f32.mrf.mxu1 }
 0x1cd   :  { %v1000_v19 = vmax.f32 %v699_v15, 0.0  ;;  %2665 = vmatmul.msk.f32.gmra.mxu0 %vm173_vm0, %v99_v12 }
 0x1cf   :  { %2777 = vmatmul.msk.f32.gmra.mxu1 %vm1090_vm1, %v1000_v19  ;;  %2842 = vmatmul.msk.f32.gmra.mxu2 %vm1090_vm1, %v1065_v63  ;;  %v896_v7 = vpop.f32.mrf.mxu3  ;;  %v3826_v19 = vpop.f32.mrf.mxu2 }
 0x1d0   :  { %2731 = vmatmul.msk.f32.gmra.mxu3 %vm173_vm0, %v165_v4  ;;  %v897_v10 = vadd.f32 %v3755_v25, %v896_v7 }
 0x1d2   :  { %v701_v26 = vpop.f32.mrf.mxu0  ;;  %v1066_v14 = vmax.f32 %v897_v10, 0.0 }
 0x1d3   :  { %v702_v29 = vadd.f32 %v3755_v25, %v701_v26  ;;  %v105_v26 = vld [vmem:[%s4486_s0 + $0x1f8] sm:$0xff] }
 0x1d4   :  { %v3759_v30 = vpop.f32.mrf.mxu1 }
 0x1d5   :  { %v1001_v32 = vmax.f32 %v702_v29, 0.0  ;;  %2666 = vmatmul.msk.f32.gmra.mxu0 %vm173_vm0, %v100_v24 }
 0x1d7   :  { %2778 = vmatmul.msk.f32.gmra.mxu1 %vm1090_vm1, %v1001_v32  ;;  %2843 = vmatmul.msk.f32.gmra.mxu2 %vm1090_vm1, %v1066_v14  ;;  %v899_v20 = vpop.f32.mrf.mxu3 }
 0x1d8   :  { %2732 = vmatmul.msk.f32.gmra.mxu3 %vm173_vm0, %v166_v17  ;;  %v900_v24 = vadd.f32 %v3755_v25, %v899_v20  ;;  %v1568_v20 = vadd.f32 %v3552_v2, %v3738_v16 }
 0x1da   :  { %v704_v38 = vpop.f32.mrf.mxu0  ;;  %v1067_v31 = vmax.f32 %v900_v24, 0.0 }
 0x1db   :  { %v705_v40 = vadd.f32 %v3755_v25, %v704_v38  ;;  %v3841_v38 = vpop.f32.mrf.mxu2 }
 0x1dc   :  { %v3775_v41 = vpop.f32.mrf.mxu1 }
 0x1dd   :  { %v1002_v23 = vmax.f32 %v705_v40, 0.0  ;;  %2667 = vmatmul.msk.f32.gmra.mxu0 %vm173_vm0, %v101_v9  ;;  %v1574_v63 = vadd.f32 %v3552_v2, %v3775_v41  ;;  %v1571_v41 = vadd.f32 %v3552_v2, %v3759_v30 }
 0x1df   :  { %2779 = vmatmul.msk.f32.gmra.mxu1 %vm1090_vm1, %v1002_v23  ;;  %2844 = vmatmul.msk.f32.gmra.mxu2 %vm1090_vm1, %v1067_v31  ;;  %v902_v40 = vpop.f32.mrf.mxu3  ;;  %v106_v23 = vld [vmem:[%s4486_s0 + $0x200] sm:$0xff]  ;;  %v1565_v31 = vadd.f32 %v3552_v2, %v3724_v6 }
 0x1e0   :  { %2733 = vmatmul.msk.f32.gmra.mxu3 %vm173_vm0, %v167_v36  ;;  %v903_v43 = vadd.f32 %v3755_v25, %v902_v40  ;;  %v109_v36 = vld [vmem:[%s4486_s0 + $0x218] sm:$0xff] }
 0x1e1   :  { %v1900_v40 = vmax.f32 %v1565_v31, 0.0 }
 0x1e2   :  { %v707_v48 = vpop.f32.mrf.mxu0 }
 0x1e3   :  { %v708_v55 = vadd.f32 %v3755_v25, %v707_v48  ;;  %v3861_v54 = vpop.f32.mrf.mxu2 }
 0x1e4   :  { %v3791_v51 = vpop.f32.mrf.mxu1 }
 0x1e5   :  { %v1003_v53 = vmax.f32 %v708_v55, 0.0  ;;  %2668 = vmatmul.msk.f32.gmra.mxu0 %vm173_vm0, %v102_v49  ;;  %v1068_v55 = vmax.f32 %v903_v43, 0.0  ;;  %v1577_v3 = vadd.f32 %v3552_v2, %v3791_v51 }
 0x1e7   :  { %2780 = vmatmul.msk.f32.gmra.mxu1 %vm1090_vm1, %v1003_v53  ;;  %v168_v53 = vld [vmem:[%s4486_s0 + $0x3f0] sm:$0xff]  ;;  %2845 = vmatmul.msk.f32.gmra.mxu2 %vm1090_vm1, %v1068_v55 }
 0x1e8   :  { %2734 = vmatmul.msk.f32.gmra.mxu3 %vm173_vm0, %v168_v53 }
 0x1ea   :  { %v710_v58 = vpop.f32.mrf.mxu0 }
 0x1eb   :  { %v711_v61 = vadd.f32 %v3755_v25, %v710_v58  ;;  %v3883_v10 = vpop.f32.mrf.mxu2 }
 0x1ec   :  { %v1579_v62 = vpop.f32.mrf.mxu1 }
 0x1ed   :  { %v1004_v1 = vmax.f32 %v711_v61, 0.0  ;;  %2669 = vmatmul.msk.f32.gmra.mxu0 %vm173_vm0, %v103_v60  ;;  %v1580_v45 = vadd.f32 %v3552_v2, %v1579_v62  ;;  %v905_v60 = vpop.f32.mrf.mxu3  ;;  %v107_v61 = vld [vmem:[%s4486_s0 + $0x208] sm:$0xff] }
 0x1ee   :  { %v906_v62 = vadd.f32 %v3755_v25, %v905_v60 }
 0x1ef   :  { %2781 = vmatmul.msk.f32.gmra.mxu1 %vm1090_vm1, %v1004_v1  ;;  %v1905_v58 = vmax.f32 %v1580_v45, 0.0  ;;  %v1904_v1 = vmax.f32 %v1577_v3, 0.0  ;;  %v1556_v3 = vadd.f32 %v3552_v2, %v3671_v18 }
 0x1f0   :  { %v1069_v7 = vmax.f32 %v906_v62, 0.0 }
 0x1f2   :  { %v713_v46 = vpop.f32.mrf.mxu0  ;;  %2846 = vmatmul.msk.f32.gmra.mxu2 %vm1090_vm1, %v1069_v7  ;;  %v111_v7 = vld [vmem:[%s4486_s0 + $0x228] sm:$0xff] }
 0x1f3   :  { %v714_v11 = vadd.f32 %v3755_v25, %v713_v46 }
 0x1f4   :  { %v1582_v12 = vpop.f32.mrf.mxu1 }
 0x1f5   :  { %v1005_v15 = vmax.f32 %v714_v11, 0.0  ;;  %2670 = vmatmul.msk.f32.gmra.mxu0 %vm173_vm0, %v104_v8  ;;  %v1583_v9 = vadd.f32 %v3552_v2, %v1582_v12  ;;  %v169_v8 = vld [vmem:[%s4486_s0 + $0x3f8] sm:$0xff]  ;;  %v1903_v11 = vmax.f32 %v1574_v63, 0.0  ;;  %v908_v12 = vpop.f32.mrf.mxu3  ;;  %v1553_v63 = vadd.f32 %v3552_v2, %v3651_v37 }
 0x1f6   :  { %2735 = vmatmul.msk.f32.gmra.mxu3 %vm173_vm0, %v169_v8  ;;  %v909_v17 = vadd.f32 %v3755_v25, %v908_v12  ;;  %v1550_v8 = vadd.f32 %v3552_v2, %v3631_v57 }
 0x1f7   :  { %2782 = vmatmul.msk.f32.gmra.mxu1 %vm1090_vm1, %v1005_v15  ;;  %v1906_v48 = vmax.f32 %v1583_v9, 0.0  ;;  %v108_v15 = vld [vmem:[%s4486_s0 + $0x210] sm:$0xff] }
 0x1f8   :  { %v1070_v24 = vmax.f32 %v909_v17, 0.0  ;;  %v1547_v17 = vadd.f32 %v3552_v2, %v3611_v13 }
 0x1fa   :  { %v716_v28 = vpop.f32.mrf.mxu0  ;;  %v1894_v31 = vmax.f32 %v1547_v17, 0.0 }
 0x1fb   :  { %v717_v27 = vadd.f32 %v3755_v25, %v716_v28  ;;  %v1902_v28 = vmax.f32 %v1571_v41, 0.0  ;;  %v1896_v41 = vmax.f32 %v1553_v63, 0.0 }
 0x1fc   :  { %v1585_v29 = vpop.f32.mrf.mxu1 }
 0x1fd   :  { %v1006_v32 = vmax.f32 %v717_v27, 0.0  ;;  %v1586_v33 = vadd.f32 %v3552_v2, %v1585_v29  ;;  %2671 = vmatmul.msk.f32.gmra.mxu0 %vm173_vm0, %v105_v26  ;;  %v3901_v29 = vpop.f32.mrf.mxu2  ;;  %2847 = vmatmul.msk.f32.gmra.mxu2 %vm1090_vm1, %v1070_v24  ;;  %v911_v16 = vpop.f32.mrf.mxu3 }
 0x1fe   :  { %v912_v9 = vadd.f32 %v3755_v25, %v911_v16 }
 0x1ff   :  { %v1907_v39 = vmax.f32 %v1586_v33, 0.0  ;;  %2783 = vmatmul.msk.f32.gmra.mxu1 %vm1090_vm1, %v1006_v32  ;;  %v1901_v32 = vmax.f32 %v1568_v20, 0.0  ;;  %v1895_v20 = vmax.f32 %v1550_v8, 0.0 }
 0x201   :  { %2881 = vmatpush.xpose.msk.msrb.mxu3 %vm2004_vm2, %v1907_v39  ;;  %v1562_v39 = vadd.f32 %v3552_v2, %v3709_v59 }
 0x202   :  { %v719_v42 = vpop.f32.mrf.mxu0 }
 0x203   :  { %v720_v49 = vadd.f32 %v3755_v25, %v719_v42 }
 0x204   :  { %v3853_v50 = vpop.f32.mrf.mxu1 }
 0x205   :  { %v1007_v52 = vmax.f32 %v720_v49, 0.0  ;;  %2672 = vmatmul.msk.f32.gmra.mxu0 %vm173_vm0, %v106_v23  ;;  %2882 = vmatpush.xpose.msk.msrb.mxu3 %vm2004_vm2, %v1906_v48  ;;  %v1071_v23 = vmax.f32 %v912_v9, 0.0  ;;  %v3919_v45 = vpop.f32.mrf.mxu2  ;;  %v1559_v48 = vadd.f32 %v3552_v2, %v3691_v0  ;;  %v1899_v49 = vmax.f32 %v1562_v39, 0.0  ;;  %v914_v59 = vpop.f32.mrf.mxu3 }
 0x206   :  { %v915_v53 = vadd.f32 %v3755_v25, %v914_v59  ;;  %v1541_v9 = vadd.f32 %v3552_v2, %v3571_v22 }
 0x207   :  { %2784 = vmatmul.msk.f32.gmra.mxu1 %vm1090_vm1, %v1007_v52  ;;  %2848 = vmatmul.msk.f32.gmra.mxu2 %vm1090_vm1, %v1071_v23  ;;  %v110_v52 = vld [vmem:[%s4486_s0 + $0x220] sm:$0xff] }
 0x209   :  { %2883 = vmatpush.xpose.msk.msrb.mxu3 %vm2004_vm2, %v1905_v58  ;;  %v1898_v58 = vmax.f32 %v1559_v48, 0.0 }
 0x20a   :  { %v722_v47 = vpop.f32.mrf.mxu0 }
 0x20b   :  { %v723_v4 = vadd.f32 %v3755_v25, %v722_v47  ;;  %v1072_v47 = vmax.f32 %v915_v53, 0.0 }
 0x20c   :  { %v3875_v51 = vpop.f32.mrf.mxu1 }
 0x20d   :  { %v1008_v46 = vmax.f32 %v723_v4, 0.0  ;;  %2673 = vmatmul.msk.f32.gmra.mxu0 %vm173_vm0, %v107_v61  ;;  %2884 = vmatpush.xpose.msk.msrb.mxu3 %vm2004_vm2, %v1904_v1  ;;  %v3937_v62 = vpop.f32.mrf.mxu2  ;;  %v1897_v1 = vmax.f32 %v1556_v3, 0.0  ;;  %v917_v18 = vpop.f32.mrf.mxu3  ;;  %v114_v3 = vld [vmem:[%s4486_s0 + $0x240] sm:$0xff] }
 0x20f   :  { %2785 = vmatmul.msk.f32.gmra.mxu1 %vm1090_vm1, %v1008_v46  ;;  %2849 = vmatmul.msk.f32.gmra.mxu2 %vm1090_vm1, %v1072_v47  ;;  %v918_v46 = vadd.f32 %v3755_v25, %v917_v18 }
 0x211   :  { %2885 = vmatpush.xpose.msk.msrb.mxu3 %vm2004_vm2, %v1903_v11  ;;  %v1073_v12 = vmax.f32 %v918_v46, 0.0 }
 0x212   :  { %v725_v14 = vpop.f32.mrf.mxu0 }
 0x213   :  { %v726_v26 = vadd.f32 %v3755_v25, %v725_v14 }
 0x214   :  { %v3897_v30 = vpop.f32.mrf.mxu1 }
 0x215   :  { %v1009_v27 = vmax.f32 %v726_v26, 0.0  ;;  %2674 = vmatmul.msk.f32.gmra.mxu0 %vm173_vm0, %v108_v15  ;;  %2886 = vmatpush.xpose.msk.msrb.mxu3 %vm2004_vm2, %v1902_v28  ;;  %v3955_v15 = vpop.f32.mrf.mxu2  ;;  %v920_v57 = vpop.f32.mrf.mxu3  ;;  %v112_v26 = vld [vmem:[%s4486_s0 + $0x230] sm:$0xff] }
 0x216   :  { %v921_v24 = vadd.f32 %v3755_v25, %v920_v57  ;;  %v116_v57 = vld [vmem:[%s4486_s0 + $0x250] sm:$0xff] }
 0x217   :  { %2786 = vmatmul.msk.f32.gmra.mxu1 %vm1090_vm1, %v1009_v27  ;;  %2850 = vmatmul.msk.f32.gmra.mxu2 %vm1090_vm1, %v1073_v12  ;;  %v1544_v27 = vadd.f32 %v3552_v2, %v3591_v34 }
 0x218   :  { %v1074_v16 = vmax.f32 %v921_v24, 0.0 }
 0x219   :  { %2887 = vmatpush.xpose.msk.msrb.mxu3 %vm2004_vm2, %v1901_v32  ;;  %v1893_v39 = vmax.f32 %v1544_v27, 0.0 }
 0x21a   :  { %v728_v33 = vpop.f32.mrf.mxu0 }
 0x21b   :  { %v729_v42 = vadd.f32 %v3755_v25, %v728_v33 }
 0x21c   :  { %v3915_v6 = vpop.f32.mrf.mxu1 }
 0x21d   :  { %v1010_v43 = vmax.f32 %v729_v42, 0.0  ;;  %2675 = vmatmul.msk.f32.gmra.mxu0 %vm173_vm0, %v109_v36  ;;  %2888 = vmatpush.xpose.msk.msrb.mxu3 %vm2004_vm2, %v1900_v40  ;;  %v3973_v36 = vpop.f32.mrf.mxu2  ;;  %v923_v34 = vpop.f32.mrf.mxu3  ;;  %v113_v42 = vld [vmem:[%s4486_s0 + $0x238] sm:$0xff] }
 0x21e   :  { %v924_v23 = vadd.f32 %v3755_v25, %v923_v34 }
 0x21f   :  { %2787 = vmatmul.msk.f32.gmra.mxu1 %vm1090_vm1, %v1010_v43  ;;  %2851 = vmatmul.msk.f32.gmra.mxu2 %vm1090_vm1, %v1074_v16  ;;  %v1892_v43 = vmax.f32 %v1541_v9, 0.0  ;;  %v117_v9 = vld [vmem:[%s4486_s0 + $0x258] sm:$0xff] }
 0x220   :  { %v1075_v59 = vmax.f32 %v924_v23, 0.0 }
 0x221   :  { %2889 = vmatpush.xpose.msk.msrb.mxu3 %vm2004_vm2, %v1899_v49 }
 0x222   :  { %v731_v55 = vpop.f32.mrf.mxu0 }
 0x223   :  { %v732_v60 = vadd.f32 %v3755_v25, %v731_v55 }
 0x224   :  { %v3933_v0 = vpop.f32.mrf.mxu1 }
 0x225   :  { %v1011_v61 = vmax.f32 %v732_v60, 0.0  ;;  %2676 = vmatmul.msk.f32.gmra.mxu0 %vm173_vm0, %v110_v52  ;;  %2890 = vmatpush.xpose.msk.msrb.mxu3 %vm2004_vm2, %v1898_v58  ;;  %v3989_v55 = vpop.f32.mrf.mxu2  ;;  %v926_v52 = vpop.f32.mrf.mxu3 }
 0x226   :  { %v927_v58 = vadd.f32 %v3755_v25, %v926_v52 }
 0x227   :  { %2788 = vmatmul.msk.f32.gmra.mxu1 %vm1090_vm1, %v1011_v61  ;;  %2852 = vmatmul.msk.f32.gmra.mxu2 %vm1090_vm1, %v1075_v59 }
 0x228   :  { %v1076_v61 = vmax.f32 %v927_v58, 0.0 }
 0x229   :  { %2891 = vmatpush.xpose.msk.msrb.mxu3 %vm2004_vm2, %v1897_v1 }
 0x22a   :  { %v734_v4 = vpop.f32.mrf.mxu0 }
 0x22b   :  { %v735_v11 = vadd.f32 %v3755_v25, %v734_v4 }
 0x22c   :  { %v3951_v37 = vpop.f32.mrf.mxu1 }
 0x22d   :  { %v1012_v14 = vmax.f32 %v735_v11, 0.0  ;;  %2677 = vmatmul.msk.f32.gmra.mxu0 %vm173_vm0, %v111_v7  ;;  %2892 = vmatpush.xpose.msk.msrb.mxu3 %vm2004_vm2, %v1896_v41  ;;  %v4001_v1 = vpop.f32.mrf.mxu2  ;;  %v929_v18 = vpop.f32.mrf.mxu3  ;;  %v115_v7 = vld [vmem:[%s4486_s0 + $0x248] sm:$0xff] }
 0x22e   :  { %v930_v46 = vadd.f32 %v3755_v25, %v929_v18 }
 0x22f   :  { %2789 = vmatmul.msk.f32.gmra.mxu1 %vm1090_vm1, %v1012_v14  ;;  %2853 = vmatmul.msk.f32.gmra.mxu2 %vm1090_vm1, %v1076_v61 }
 0x230   :  { %v1077_v11 = vmax.f32 %v930_v46, 0.0 }
 0x231   :  { %2893 = vmatpush.xpose.msk.msrb.mxu3 %vm2004_vm2, %v1895_v20 }
 0x232   :  { %v737_v28 = vpop.f32.mrf.mxu0 }
 0x233   :  { %v738_v32 = vadd.f32 %v3755_v25, %v737_v28 }
 0x234   :  { %v3969_v13 = vpop.f32.mrf.mxu1 }
 0x235   :  { %v1013_v33 = vmax.f32 %v738_v32, 0.0  ;;  %2678 = vmatmul.msk.f32.gmra.mxu0 %vm173_vm0, %v112_v26  ;;  %2894 = vmatpush.xpose.msk.msrb.mxu3 %vm2004_vm2, %v1894_v31  ;;  %v4013_v14 = vpop.f32.mrf.mxu2  ;;  %v932_v17 = vpop.f32.mrf.mxu3 }
 0x236   :  { %v933_v28 = vadd.f32 %v3755_v25, %v932_v17 }
 0x237   :  { %2790 = vmatmul.msk.f32.gmra.mxu1 %vm1090_vm1, %v1013_v33  ;;  %2854 = vmatmul.msk.f32.gmra.mxu2 %vm1090_vm1, %v1077_v11 }
 0x238   :  { %v1078_v27 = vmax.f32 %v933_v28, 0.0 }
 0x239   :  { %2895 = vmatpush.xpose.msk.msrb.mxu3 %vm2004_vm2, %v1893_v39 }
 0x23a   :  { %v740_v40 = vpop.f32.mrf.mxu0 }
 0x23b   :  { %v741_v48 = vadd.f32 %v3755_v25, %v740_v40 }
 0x23c   :  { %v3985_v49 = vpop.f32.mrf.mxu1 }
 0x23d   :  { %v1014_v22 = vmax.f32 %v741_v48, 0.0  ;;  %2679 = vmatmul.msk.f32.gmra.mxu0 %vm173_vm0, %v113_v42  ;;  %2896 = vmatpush.xpose.msk.msrb.mxu3 %vm2004_vm2, %v1892_v43  ;;  %v4025_v32 = vpop.f32.mrf.mxu2  ;;  %v935_v16 = vpop.f32.mrf.mxu3 }
 0x23e   :  { %v936_v39 = vadd.f32 %v3755_v25, %v935_v16 }
 0x23f   :  { %2791 = vmatmul.msk.f32.gmra.mxu1 %vm1090_vm1, %v1014_v22  ;;  %2855 = vmatmul.msk.f32.gmra.mxu2 %vm1090_vm1, %v1078_v27  ;;  %v118_v22 = vld [vmem:[%s4486_s0 + $0x260] sm:$0xff] }
 0x240   :  { %v1079_v42 = vmax.f32 %v936_v39, 0.0 }
 0x242   :  { %v743_v53 = vpop.f32.mrf.mxu0 }
 0x243   :  { %v744_v60 = vadd.f32 %v3755_v25, %v743_v53 }
 0x244   :  { %v3998_v47 = vpop.f32.mrf.mxu1 }
 0x245   :  { %v1015_v63 = vmax.f32 %v744_v60, 0.0  ;;  %2680 = vmatmul.msk.f32.gmra.mxu0 %vm173_vm0, %v114_v3  ;;  %v4037_v43 = vpop.f32.mrf.mxu2  ;;  %v938_v48 = vpop.f32.mrf.mxu3 }
 0x246   :  { %v939_v52 = vadd.f32 %v3755_v25, %v938_v48 }
 0x247   :  { %2792 = vmatmul.msk.f32.gmra.mxu1 %vm1090_vm1, %v1015_v63  ;;  %2856 = vmatmul.msk.f32.gmra.mxu2 %vm1090_vm1, %v1079_v42 }
 0x248   :  { %v1080_v58 = vmax.f32 %v939_v52, 0.0 }
 0x24a   :  { %v746_v4 = vpop.f32.mrf.mxu0 }
 0x24b   :  { %v747_v8 = vadd.f32 %v3755_v25, %v746_v4  ;;  %v119_v4 = vld [vmem:[%s4486_s0 + $0x268] sm:$0xff] }
 0x24c   :  { %v4010_v41 = vpop.f32.mrf.mxu1 }
 0x24d   :  { %v1016_v12 = vmax.f32 %v747_v8, 0.0  ;;  %2681 = vmatmul.msk.f32.gmra.mxu0 %vm173_vm0, %v115_v7  ;;  %v4047_v61 = vpop.f32.mrf.mxu2  ;;  %v941_v63 = vpop.f32.mrf.mxu3 }
 0x24e   :  { %v942_v7 = vadd.f32 %v3755_v25, %v941_v63 }
 0x24f   :  { %2793 = vmatmul.msk.f32.gmra.mxu1 %vm1090_vm1, %v1016_v12  ;;  %2857 = vmatmul.msk.f32.gmra.mxu2 %vm1090_vm1, %v1080_v58 }
 0x250   :  { %v1081_v11 = vmax.f32 %v942_v7, 0.0 }
 0x252   :  { %v749_v20 = vpop.f32.mrf.mxu0 }
 0x253   :  { %v750_v26 = vadd.f32 %v3755_v25, %v749_v20 }
 0x254   :  { %v4022_v24 = vpop.f32.mrf.mxu1 }
 0x255   :  { %v1017_v31 = vmax.f32 %v750_v26, 0.0  ;;  %2682 = vmatmul.msk.f32.gmra.mxu0 %vm173_vm0, %v116_v57  ;;  %v4057_v17 = vpop.f32.mrf.mxu2  ;;  %v944_v20 = vpop.f32.mrf.mxu3 }
 0x256   :  { %v945_v28 = vadd.f32 %v3755_v25, %v944_v20 }
 0x257   :  { %2794 = vmatmul.msk.f32.gmra.mxu1 %vm1090_vm1, %v1017_v31  ;;  %2858 = vmatmul.msk.f32.gmra.mxu2 %vm1090_vm1, %v1081_v11 }
 0x258   :  { %v1082_v31 = vmax.f32 %v945_v28, 0.0 }
 0x25a   :  { %v752_v33 = vpop.f32.mrf.mxu0 }
 0x25b   :  { %v753_v34 = vadd.f32 %v3755_v25, %v752_v33 }
 0x25c   :  { %v4034_v40 = vpop.f32.mrf.mxu1 }
 0x25d   :  { %v1018_v23 = vmax.f32 %v753_v34, 0.0  ;;  %2683 = vmatmul.msk.f32.gmra.mxu0 %vm173_vm0, %v117_v9  ;;  %v4063_v33 = vpop.f32.mrf.mxu2  ;;  %v947_v9 = vpop.f32.mrf.mxu3 }
 0x25e   :  { %v948_v34 = vadd.f32 %v3755_v25, %v947_v9 }
 0x25f   :  { %2795 = vmatmul.msk.f32.gmra.mxu1 %vm1090_vm1, %v1018_v23  ;;  %2859 = vmatmul.msk.f32.gmra.mxu2 %vm1090_vm1, %v1082_v31 }
 0x260   :  { %v1083_v48 = vmax.f32 %v948_v34, 0.0 }
 0x262   :  { %v755_v59 = vpop.f32.mrf.mxu0 }
 0x263   :  { %v756_v53 = vadd.f32 %v3755_v25, %v755_v59 }
 0x264   :  { %v1624_v3 = vpop.f32.mrf.mxu1 }
 0x265   :  { %v1019_v60 = vmax.f32 %v756_v53, 0.0  ;;  %2684 = vmatmul.msk.f32.gmra.mxu0 %vm173_vm0, %v118_v22  ;;  %v4070_v52 = vpop.f32.mrf.mxu2  ;;  %v4076_v53 = vld [vmem:[%s4490_s4] ss:$0 sm:$0xff]  ;;  %v950_v63 = vpop.f32.mrf.mxu3 }
 0x266   :  { %v1625_v28 = vadd.f32 %v4076_v53, %v1624_v3 }
 0x267   :  { %2796 = vmatmul.msk.f32.gmra.mxu1 %vm1090_vm1, %v1019_v60  ;;  %2860 = vmatmul.msk.f32.gmra.mxu2 %vm1090_vm1, %v1083_v48  ;;  %v1619_v48 = vadd.f32 %v4076_v53, %v4022_v24 }
 0x268   :  { %v1920_v9 = vmax.f32 %v1625_v28, 0.0 }
 0x26a   :  { %v758_v18 = vpop.f32.mrf.mxu0 }
 0x26b   :  { %v759_v46 = vadd.f32 %v3755_v25, %v758_v18 }
 0x26c   :  { %v1627_v8 = vpop.f32.mrf.mxu1 }
 0x26d   :  { %v1020_v12 = vmax.f32 %v759_v46, 0.0  ;;  %2685 = vmatmul.msk.f32.gmra.mxu0 %vm173_vm0, %v119_v4  ;;  %v1628_v4 = vadd.f32 %v4076_v53, %v1627_v8  ;;  %v953_v8 = vpop.f32.mrf.mxu3 }
 0x26e   :  { %v954_v31 = vadd.f32 %v3755_v25, %v953_v8 }
 0x26f   :  { %2797 = vmatmul.msk.f32.gmra.mxu1 %vm1090_vm1, %v1020_v12 }
 0x272   :  { %v761_v57 = vpop.f32.mrf.mxu0 }
 0x273   :  { %v762_v26 = vadd.f32 %v3755_v25, %v761_v57  ;;  %v4087_v57 = vpop.f32.mrf.mxu2 }
 0x274   :  { %v1630_v27 = vpop.f32.mrf.mxu1 }
 0x275   :  { %v1021_v16 = vmax.f32 %v762_v26, 0.0  ;;  %v1631_v58 = vadd.f32 %v4076_v53, %v1630_v27  ;;  %v1921_v26 = vmax.f32 %v1628_v4, 0.0 }
 0x277   :  { %2798 = vmatmul.msk.f32.gmra.mxu1 %vm1090_vm1, %v1021_v16  ;;  %v1922_v7 = vmax.f32 %v1631_v58, 0.0  ;;  %v1622_v16 = vadd.f32 %v4076_v53, %v4034_v40 }
 0x279   :  { %v956_v40 = vpop.f32.mrf.mxu3 }
 0x27a   :  { %v764_v39 = vpop.f32.mrf.mxu0  ;;  %v957_v58 = vadd.f32 %v3755_v25, %v956_v40 }
 0x27b   :  { %v765_v42 = vadd.f32 %v3755_v25, %v764_v39  ;;  %v4100_v3 = vpop.f32.mrf.mxu2 }
 0x27c   :  { %v1633_v23 = vpop.f32.mrf.mxu1  ;;  %v1086_v4 = vmax.f32 %v957_v58, 0.0 }
 0x27d   :  { %v1022_v59 = vmax.f32 %v765_v42, 0.0  ;;  %v1634_v22 = vadd.f32 %v3552_v2, %v1633_v23  ;;  %v951_v2 = vadd.f32 %v3755_v25, %v950_v63  ;;  %v1085_v42 = vmax.f32 %v954_v31, 0.0 }
 0x27e   :  { %v1918_v63 = vmax.f32 %v1619_v48, 0.0 }
 0x27f   :  { %v1923_v60 = vmax.f32 %v1634_v22, 0.0  ;;  %2799 = vmatmul.msk.f32.gmra.mxu1 %vm1090_vm1, %v1022_v59  ;;  %v1084_v12 = vmax.f32 %v951_v2, 0.0  ;;  %v1919_v59 = vmax.f32 %v1622_v16, 0.0 }
 0x281   :  { %2898 = vmatpush.xpose.msk.msra.mxu2 %vm2004_vm2, %v1923_v60  ;;  %v1616_v60 = vadd.f32 %v4076_v53, %v4010_v41 }
 0x282   :  { %v767_v18 = vpop.f32.mrf.mxu0  ;;  %2861 = vmatmul.msk.f32.gmra.mxu2 %vm1090_vm1, %v1084_v12 }
 0x283   :  { %v768_v46 = vadd.f32 %v3755_v25, %v767_v18  ;;  %v4114_v24 = vpop.f32.mrf.mxu2  ;;  %v1917_v12 = vmax.f32 %v1616_v60, 0.0 }
 0x284   :  { %v4084_v11 = vpop.f32.mrf.mxu1 }
 0x285   :  { %v1023_v20 = vmax.f32 %v768_v46, 0.0  ;;  %2899 = vmatpush.xpose.msk.msra.mxu2 %vm2004_vm2, %v1922_v7  ;;  %v1613_v46 = vadd.f32 %v4076_v53, %v3998_v47  ;;  %v4130_v47 = vld [vmem:[%s4491_s5] sm:$0xff] }
 0x286   :  { %2897 = vmatmul.msk.f32.vlgmr.msrb.gmra.mxu3 %vm2004_vm2, %v4130_v47 }
 0x287   :  { %2800 = vmatmul.msk.f32.gmra.mxu1 %vm1090_vm1, %v1023_v20  ;;  %v1610_v20 = vadd.f32 %v4076_v53, %v3985_v49  ;;  %v1916_v28 = vmax.f32 %v1613_v46, 0.0  ;;  %v1607_v49 = vadd.f32 %v4076_v53, %v3969_v13  ;;  %v1601_v13 = vadd.f32 %v4076_v53, %v3933_v0 }
 0x288   :  { %v1595_v0 = vadd.f32 %v4076_v53, %v3897_v30  ;;  %v1589_v30 = vadd.f32 %v4076_v53, %v3853_v50 }
 0x289   :  { %2900 = vmatpush.xpose.msk.msra.mxu2 %vm2004_vm2, %v1921_v26  ;;  %v1915_v16 = vmax.f32 %v1610_v20, 0.0  ;;  %v1912_v60 = vmax.f32 %v1601_v13, 0.0 }
 0x28a   :  { %v770_v27 = vpop.f32.mrf.mxu0  ;;  %2862 = vmatmul.msk.f32.gmra.mxu2 %vm1090_vm1, %v1085_v42  ;;  %v1914_v42 = vmax.f32 %v1607_v49, 0.0 }
 0x28b   :  { %v771_v39 = vadd.f32 %v3755_v25, %v770_v27  ;;  %v4132_v31 = vpop.f32.mrf.mxu2 }
 0x28c   :  { %v4097_v34 = vpop.f32.mrf.mxu1 }
 0x28d   :  { %v1024_v23 = vmax.f32 %v771_v39, 0.0  ;;  %2901 = vmatpush.xpose.msk.msra.mxu2 %vm2004_vm2, %v1920_v9  ;;  %v1604_v39 = vadd.f32 %v4076_v53, %v3951_v37  ;;  %v1598_v37 = vadd.f32 %v4076_v53, %v3915_v6  ;;  %v1592_v6 = vadd.f32 %v4076_v53, %v3875_v51 }
 0x28f   :  { %2801 = vmatmul.msk.f32.gmra.mxu1 %vm1090_vm1, %v1024_v23  ;;  %v1911_v46 = vmax.f32 %v1598_v37, 0.0  ;;  %v1909_v49 = vmax.f32 %v1592_v6, 0.0 }
 0x291   :  { %2902 = vmatpush.xpose.msk.msra.mxu2 %vm2004_vm2, %v1919_v59 }
 0x292   :  { %v773_v22 = vpop.f32.mrf.mxu0  ;;  %2863 = vmatmul.msk.f32.gmra.mxu2 %vm1090_vm1, %v1086_v4 }
 0x293   :  { %v774_v18 = vadd.f32 %v3755_v25, %v773_v22  ;;  %v4148_v40 = vpop.f32.mrf.mxu2  ;;  %v1913_v22 = vmax.f32 %v1604_v39, 0.0 }
 0x294   :  { %v4111_v2 = vpop.f32.mrf.mxu1 }
 0x295   :  { %v1025_v7 = vmax.f32 %v774_v18, 0.0  ;;  %2903 = vmatpush.xpose.msk.msra.mxu2 %vm2004_vm2, %v1918_v63 }
 0x297   :  { %2802 = vmatmul.msk.f32.gmra.mxu1 %vm1090_vm1, %v1025_v7 }
 0x299   :  { %2904 = vmatpush.xpose.msk.msra.mxu2 %vm2004_vm2, %v1917_v12 }
 0x29a   :  { %v776_v41 = vpop.f32.mrf.mxu0  ;;  %2880 = vmatmul.msk.f32.vlgmr.msrb.gmra.mxu2 %vm2004_vm2, %v4130_v47 }
 0x29b   :  { %v777_v26 = vadd.f32 %v3755_v25, %v776_v41  ;;  %v4160_v7 = vpop.f32.mrf.mxu2  ;;  %v1910_v41 = vmax.f32 %v1595_v0, 0.0 }
 0x29c   :  { %v4124_v8 = vpop.f32.mrf.mxu1 }
 0x29d   :  { %v1026_v27 = vmax.f32 %v777_v26, 0.0  ;;  %2905 = vmatpush.xpose.msk.msra.mxu2 %vm2004_vm2, %v1916_v28 }
 0x29f   :  { %2803 = vmatmul.msk.f32.gmra.mxu1 %vm1090_vm1, %v1026_v27 }
 0x2a1   :  { %2906 = vmatpush.xpose.msk.msra.mxu2 %vm2004_vm2, %v1915_v16  ;;  %v1730_v16 = vadd.f32 %v4076_v53, %v3766_v35 }
 0x2a2   :  { %v779_v9 = vpop.f32.mrf.mxu0 }
 0x2a3   :  { %v780_v23 = vadd.f32 %v3755_v25, %v779_v9  ;;  %v4172_v27 = vpop.f32.mrf.mxu2  ;;  %v1908_v9 = vmax.f32 %v1589_v30, 0.0 }
 0x2a4   :  { %v4145_v48 = vpop.f32.mrf.mxu1 }
 0x2a5   :  { %v1027_v59 = vmax.f32 %v780_v23, 0.0  ;;  %2907 = vmatpush.xpose.msk.msra.mxu2 %vm2004_vm2, %v1914_v42  ;;  %v1727_v42 = vadd.f32 %v4076_v53, %v3745_v21  ;;  %v1955_v23 = vmax.f32 %v1730_v16, 0.0 }
 0x2a7   :  { %2804 = vmatmul.msk.f32.gmra.mxu1 %vm1090_vm1, %v1027_v59  ;;  %v1954_v35 = vmax.f32 %v1727_v42, 0.0 }
 0x2a9   :  { %2908 = vmatpush.xpose.msk.msra.mxu2 %vm2004_vm2, %v1913_v22 }
 0x2aa   :  { %v782_v58 = vpop.f32.mrf.mxu0 }
 0x2ab   :  { %v783_v63 = vadd.f32 %v3755_v25, %v782_v58  ;;  %v4187_v50 = vpop.f32.mrf.mxu2 }
 0x2ac   :  { %v4157_v18 = vpop.f32.mrf.mxu1 }
 0x2ad   :  { %v1028_v4 = vmax.f32 %v783_v63, 0.0  ;;  %2909 = vmatpush.xpose.msk.msra.mxu2 %vm2004_vm2, %v1912_v60 }
 0x2af   :  { %2805 = vmatmul.msk.f32.gmra.mxu1 %vm1090_vm1, %v1028_v4 }
 0x2b1   :  { %2910 = vmatpush.xpose.msk.msra.mxu2 %vm2004_vm2, %v1911_v46 }
 0x2b2   :  { %v785_v12 = vpop.f32.mrf.mxu0 }
 0x2b3   :  { %v786_v20 = vadd.f32 %v3755_v25, %v785_v12  ;;  %v4194_v60 = vpop.f32.mrf.mxu2 }
 0x2b4   :  { %v4169_v28 = vpop.f32.mrf.mxu1 }
 0x2b5   :  { %v1029_v26 = vmax.f32 %v786_v20, 0.0  ;;  %2911 = vmatpush.xpose.msk.msra.mxu2 %vm2004_vm2, %v1910_v41 }
 0x2b7   :  { %2806 = vmatmul.msk.f32.gmra.mxu1 %vm1090_vm1, %v1029_v26 }
 0x2b9   :  { %2912 = vmatpush.xpose.msk.msra.mxu2 %vm2004_vm2, %v1909_v49 }
 0x2ba   :  { %v788_v51 = vpop.f32.mrf.mxu0 }
 0x2bb   :  { %v789_v39 = vadd.f32 %v3755_v25, %v788_v51  ;;  %v4198_v12 = vpop.f32.mrf.mxu2 }
 0x2bc   :  { %v4183_v59 = vpop.f32.mrf.mxu1 }
 0x2bd   :  { %v1030_v13 = vmax.f32 %v789_v39, 0.0  ;;  %2913 = vmatpush.xpose.msk.msra.mxu2 %vm2004_vm2, %v1908_v9 }
 0x2bf   :  { %2807 = vmatmul.msk.f32.gmra.mxu1 %vm1090_vm1, %v1030_v13 }
 0x2c0   :  { %2914 = vmatmul.msk.f32.vlgmr.msra.gmra.mxu2 %vm2004_vm2, %v4130_v47 }
 0x2c1   :  { %2932 = vmatpush.xpose.msk.msrb.mxu2 %vm2004_vm2, %v1955_v23 }
 0x2c2   :  { %v791_v22 = vpop.f32.mrf.mxu0 }
 0x2c3   :  { %v792_v21 = vadd.f32 %v3755_v25, %v791_v22  ;;  %v4202_v30 = vpop.f32.mrf.mxu2 }
 0x2c4   :  { %v1660_v58 = vpop.f32.mrf.mxu1 }
 0x2c5   :  { %2933 = vmatpush.xpose.msk.msrb.mxu2 %vm2004_vm2, %v1954_v35  ;;  %v1031_v37 = vmax.f32 %v792_v21, 0.0 }
 0x2c7   :  { %2808 = vmatmul.msk.f32.gmra.mxu1 %vm1090_vm1, %v1031_v37 }
 0x2ca   :  { %v794_v63 = vpop.f32.mrf.mxu0 }
 0x2cb   :  { %v795_v4 = vadd.f32 %v3755_v25, %v794_v63  ;;  %v4206_v39 = vpop.f32.mrf.mxu2 }
 0x2cc   :  { %v1663_v0 = vpop.f32.mrf.mxu1 }
 0x2cd   :  { %v1032_v46 = vmax.f32 %v795_v4, 0.0 }
 0x2cf   :  { %2809 = vmatmul.msk.f32.gmra.mxu1 %vm1090_vm1, %v1032_v46 }
 0x2d2   :  { %v797_v6 = vpop.f32.mrf.mxu0 }
 0x2d3   :  { %v798_v41 = vadd.f32 %v3755_v25, %v797_v6  ;;  %v4210_v22 = vpop.f32.mrf.mxu2 }
 0x2d4   :  { %v1666_v20 = vpop.f32.mrf.mxu1 }
 0x2d5   :  { %v1033_v26 = vmax.f32 %v798_v41, 0.0 }
 0x2d7   :  { %2810 = vmatmul.msk.f32.gmra.mxu1 %vm1090_vm1, %v1033_v26 }
 0x2da   :  { %v800_v49 = vpop.f32.mrf.mxu0 }
 0x2db   :  { %v801_v16 = vadd.f32 %v3755_v25, %v800_v49  ;;  %v4214_v46 = vpop.f32.mrf.mxu2 }
 0x2dc   :  { %v1669_v51 = vpop.f32.mrf.mxu1 }
 0x2dd   :  { %v1034_v9 = vmax.f32 %v801_v16, 0.0 }
 0x2df   :  { %2811 = vmatmul.msk.f32.gmra.mxu1 %vm1090_vm1, %v1034_v9 }
 0x2e2   :  { %v803_v42 = vpop.f32.mrf.mxu0 }
 0x2e3   :  { %v804_v23 = vadd.f32 %v3755_v25, %v803_v42  ;;  %v4217_v41 = vpop.f32.mrf.mxu2 }
 0x2e4   :  { %v1672_v13 = vpop.f32.mrf.mxu1 }
 0x2e5   :  { %v1035_v35 = vmax.f32 %v804_v23, 0.0 }
 0x2e7   :  { %2812 = vmatmul.msk.f32.gmra.mxu1 %vm1090_vm1, %v1035_v35 }
 0x2ea   :  { %v806_v21 = vpop.f32.mrf.mxu0 }
 0x2eb   :  { %v807_v37 = vadd.f32 %v3755_v25, %v806_v21  ;;  %v4222_v42 = vpop.f32.mrf.mxu2  ;;  %v1673_v21 = vadd.f32 %v4076_v53, %v1672_v13 }
 0x2ec   :  { %v1675_v63 = vpop.f32.mrf.mxu1 }
 0x2ed   :  { %v1036_v4 = vmax.f32 %v807_v37, 0.0  ;;  %v1676_v25 = vadd.f32 %v4076_v53, %v1675_v63  ;;  %v1667_v63 = vadd.f32 %v4076_v53, %v1666_v20  ;;  %v1658_v20 = vadd.f32 %v4076_v53, %v4183_v59 }
 0x2ee   :  { %v1649_v59 = vadd.f32 %v4076_v53, %v4145_v48  ;;  %v1640_v48 = vadd.f32 %v4076_v53, %v4097_v34  ;;  %v1775_v34 = vadd.f32 %v4076_v53, %v4013_v14  ;;  %v1769_v14 = vadd.f32 %v4076_v53, %v3989_v55 }
 0x2ef   :  { %2813 = vmatmul.msk.f32.gmra.mxu1 %vm1090_vm1, %v1036_v4  ;;  %v1937_v37 = vmax.f32 %v1676_v25, 0.0  ;;  %v1670_v4 = vadd.f32 %v4076_v53, %v1669_v51  ;;  %v1934_v13 = vmax.f32 %v1667_v63, 0.0  ;;  %v1760_v55 = vadd.f32 %v4076_v53, %v3937_v62 }
 0x2f0   :  { %v1751_v62 = vadd.f32 %v4076_v53, %v3883_v10  ;;  %v1742_v10 = vadd.f32 %v4076_v53, %v3826_v19 }
 0x2f4   :  { %v1678_v6 = vpop.f32.mrf.mxu1 }
 0x2f5   :  { %v1679_v16 = vadd.f32 %v4076_v53, %v1678_v6  ;;  %v1936_v6 = vmax.f32 %v1673_v21, 0.0 }
 0x2f7   :  { %v1938_v23 = vmax.f32 %v1679_v16, 0.0  ;;  %v1935_v16 = vmax.f32 %v1670_v4, 0.0 }
 0x2fc   :  { %v1681_v26 = vpop.f32.mrf.mxu1 }
 0x2fd   :  { %v1682_v49 = vadd.f32 %v4076_v53, %v1681_v26 }
 0x2ff   :  { %v1939_v9 = vmax.f32 %v1682_v49, 0.0  ;;  %v4233_v49 = vpop.f32.mrf.mxu2 }
 0x301   :  { %2915 = vmatpush.xpose.msk.msra.mxu3 %vm2004_vm2, %v1939_v9  ;;  %v1664_v9 = vadd.f32 %v4076_v53, %v1663_v0  ;;  %v1655_v0 = vadd.f32 %v4076_v53, %v4169_v28 }
 0x303   :  { %v1933_v21 = vmax.f32 %v1664_v9, 0.0 }
 0x304   :  { %v4225_v35 = vpop.f32.mrf.mxu1 }
 0x305   :  { %2916 = vmatpush.xpose.msk.msra.mxu3 %vm2004_vm2, %v1938_v23  ;;  %v1661_v23 = vadd.f32 %v4076_v53, %v1660_v58  ;;  %v1652_v58 = vadd.f32 %v4076_v53, %v4157_v18  ;;  %v1643_v18 = vadd.f32 %v4076_v53, %v4111_v2  ;;  %v1778_v2 = vadd.f32 %v4076_v53, %v4025_v32 }
 0x307   :  { %v4242_v51 = vpop.f32.mrf.mxu2 }
 0x309   :  { %2917 = vmatpush.xpose.msk.msra.mxu3 %vm2004_vm2, %v1937_v37  ;;  %v1932_v37 = vmax.f32 %v1661_v23, 0.0  ;;  %v1646_v23 = vadd.f32 %v4076_v53, %v4124_v8  ;;  %v1637_v8 = vadd.f32 %v4076_v53, %v4084_v11  ;;  %v1772_v11 = vadd.f32 %v4076_v53, %v4001_v1 }
 0x30a   :  { %v1763_v1 = vadd.f32 %v4076_v53, %v3955_v15  ;;  %v1754_v15 = vadd.f32 %v4076_v53, %v3901_v29  ;;  %v1745_v29 = vadd.f32 %v4076_v53, %v3841_v38 }
 0x30b   :  { %v1969_v32 = vmax.f32 %v1772_v11, 0.0 }
 0x30c   :  { %v4231_v26 = vpop.f32.mrf.mxu1 }
 0x30d   :  { %2918 = vmatpush.xpose.msk.msra.mxu3 %vm2004_vm2, %v1936_v6  ;;  %v1931_v6 = vmax.f32 %v1658_v20, 0.0 }
 0x30f   :  { %v4253_v63 = vpop.f32.mrf.mxu2 }
 0x311   :  { %2919 = vmatpush.xpose.msk.msra.mxu3 %vm2004_vm2, %v1935_v16  ;;  %v1930_v16 = vmax.f32 %v1655_v0, 0.0  ;;  %v1926_v0 = vmax.f32 %v1643_v18, 0.0  ;;  %v1970_v18 = vmax.f32 %v1775_v34, 0.0 }
 0x314   :  { %v4239_v25 = vpop.f32.mrf.mxu1 }
 0x315   :  { %2920 = vmatpush.xpose.msk.msra.mxu3 %vm2004_vm2, %v1934_v13  ;;  %v1929_v13 = vmax.f32 %v1652_v58, 0.0 }
 0x317   :  { %v4264_v28 = vpop.f32.mrf.mxu2 }
 0x319   :  { %2921 = vmatpush.xpose.msk.msra.mxu3 %vm2004_vm2, %v1933_v21  ;;  %v1928_v21 = vmax.f32 %v1649_v59, 0.0  ;;  %v1924_v59 = vmax.f32 %v1637_v8, 0.0 }
 0x31c   :  { %v4248_v4 = vpop.f32.mrf.mxu1 }
 0x31d   :  { %2922 = vmatpush.xpose.msk.msra.mxu3 %vm2004_vm2, %v1932_v37  ;;  %v1927_v37 = vmax.f32 %v1646_v23, 0.0 }
 0x31f   :  { %v4278_v58 = vpop.f32.mrf.mxu2 }
 0x321   :  { %2923 = vmatpush.xpose.msk.msra.mxu3 %vm2004_vm2, %v1931_v6 }
 0x324   :  { %v4258_v9 = vpop.f32.mrf.mxu1 }
 0x325   :  { %2924 = vmatpush.xpose.msk.msra.mxu3 %vm2004_vm2, %v1930_v16  ;;  %v1925_v16 = vmax.f32 %v1640_v48, 0.0  ;;  %v1766_v48 = vadd.f32 %v4076_v53, %v3973_v36  ;;  %v1757_v36 = vadd.f32 %v4076_v53, %v3919_v45  ;;  %v1748_v45 = vadd.f32 %v4076_v53, %v3861_v54 }
 0x326   :  { %v1739_v54 = vadd.f32 %v4076_v53, %v3812_v5 }
 0x329   :  { %2925 = vmatpush.xpose.msk.msra.mxu3 %vm2004_vm2, %v1929_v13  ;;  %v1971_v13 = vmax.f32 %v1778_v2, 0.0 }
 0x32c   :  { %v4268_v20 = vpop.f32.mrf.mxu1 }
 0x32d   :  { %2926 = vmatpush.xpose.msk.msra.mxu3 %vm2004_vm2, %v1928_v21  ;;  %v4292_v21 = vpop.f32.mrf.mxu2 }
 0x331   :  { %2927 = vmatpush.xpose.msk.msra.mxu3 %vm2004_vm2, %v1927_v37 }
 0x334   :  { %v4276_v6 = vpop.f32.mrf.mxu1 }
 0x335   :  { %2928 = vmatpush.xpose.msk.msra.mxu3 %vm2004_vm2, %v1926_v0  ;;  %v1968_v0 = vmax.f32 %v1769_v14, 0.0  ;;  %v4306_v8 = vpop.f32.mrf.mxu2  ;;  %v1963_v14 = vmax.f32 %v1754_v15, 0.0 }
 0x339   :  { %2929 = vmatpush.xpose.msk.msra.mxu3 %vm2004_vm2, %v1925_v16  ;;  %v1967_v16 = vmax.f32 %v1766_v48, 0.0 }
 0x33c   :  { %v4288_v23 = vpop.f32.mrf.mxu1 }
 0x33d   :  { %2930 = vmatpush.xpose.msk.msra.mxu3 %vm2004_vm2, %v1924_v59  ;;  %v1966_v59 = vmax.f32 %v1763_v1, 0.0  ;;  %v1864_v34 = vpop.f32.mrf.mxu2  ;;  %v1961_v1 = vmax.f32 %v1748_v45, 0.0 }
 0x340   :  { %2931 = vmatmul.msk.f32.vlgmr.msra.gmra.mxu3 %vm2004_vm2, %v4130_v47 }
 0x341   :  { %2949 = vmatpush.xpose.msk.msrb.mxu3 %vm2004_vm2, %v1971_v13  ;;  %v1965_v13 = vmax.f32 %v1760_v55, 0.0 }
 0x344   :  { %v4301_v37 = vpop.f32.mrf.mxu1 }
 0x345   :  { %2950 = vmatpush.xpose.msk.msrb.mxu3 %vm2004_vm2, %v1970_v18  ;;  %v1964_v18 = vmax.f32 %v1757_v36, 0.0  ;;  %v1867_v48 = vpop.f32.mrf.mxu2  ;;  %v1959_v36 = vmax.f32 %v1742_v10, 0.0 }
 0x349   :  { %2951 = vmatpush.xpose.msk.msrb.mxu3 %vm2004_vm2, %v1969_v32 }
 0x34c   :  { %v1711_v2 = vpop.f32.mrf.mxu1 }
 0x34d   :  { %2952 = vmatpush.xpose.msk.msrb.mxu3 %vm2004_vm2, %v1968_v0  ;;  %v1962_v0 = vmax.f32 %v1751_v62, 0.0  ;;  %v1870_v55 = vpop.f32.mrf.mxu2  ;;  %v1736_v62 = vadd.f32 %v4076_v53, %v3798_v56 }
 0x34e   :  { %v1871_v10 = vadd.f32 %v4076_v53, %v1870_v55 }
 0x351   :  { %2953 = vmatpush.xpose.msk.msrb.mxu3 %vm2004_vm2, %v1967_v16 }
 0x354   :  { %v1714_v11 = vpop.f32.mrf.mxu1 }
 0x355   :  { %2954 = vmatpush.xpose.msk.msrb.mxu3 %vm2004_vm2, %v1966_v59  ;;  %v1960_v59 = vmax.f32 %v1745_v29, 0.0  ;;  %v1873_v19 = vpop.f32.mrf.mxu2  ;;  %v1733_v29 = vadd.f32 %v4076_v53, %v3782_v44  ;;  %v1715_v56 = vadd.f32 %v4076_v53, %v1714_v11  ;;  %v1868_v44 = vadd.f32 %v4076_v53, %v1867_v48 }
 0x356   :  { %v1709_v11 = vadd.f32 %v4076_v53, %v4301_v37  ;;  %v1703_v37 = vadd.f32 %v4076_v53, %v4276_v6  ;;  %v1697_v6 = vadd.f32 %v4076_v53, %v4258_v9  ;;  %v1691_v9 = vadd.f32 %v4076_v53, %v4239_v25 }
 0x357   :  { %v1685_v25 = vadd.f32 %v4076_v53, %v4225_v35  ;;  %v1838_v35 = vadd.f32 %v4076_v53, %v4217_v41  ;;  %v1817_v41 = vadd.f32 %v4076_v53, %v4187_v50  ;;  %v1811_v50 = vadd.f32 %v4076_v53, %v4160_v7 }
 0x358   :  { %v1948_v48 = vmax.f32 %v1709_v11, 0.0  ;;  %v1802_v7 = vadd.f32 %v4076_v53, %v4114_v24  ;;  %v1790_v24 = vadd.f32 %v4076_v53, %v4063_v33 }
 0x359   :  { %2955 = vmatpush.xpose.msk.msrb.mxu3 %vm2004_vm2, %v1965_v13 }
 0x35c   :  { %v1717_v32 = vpop.f32.mrf.mxu1 }
 0x35d   :  { %2956 = vmatpush.xpose.msk.msrb.mxu3 %vm2004_vm2, %v1964_v18  ;;  %v1718_v5 = vadd.f32 %v4076_v53, %v1717_v32  ;;  %v1712_v32 = vadd.f32 %v4076_v53, %v1711_v2  ;;  %v1706_v2 = vadd.f32 %v4076_v53, %v4288_v23  ;;  %v1700_v23 = vadd.f32 %v4076_v53, %v4268_v20 }
 0x35e   :  { %v1694_v20 = vadd.f32 %v4076_v53, %v4248_v4  ;;  %v1688_v4 = vadd.f32 %v4076_v53, %v4231_v26  ;;  %v1841_v26 = vadd.f32 %v4076_v53, %v4222_v42 }
 0x35f   :  { %v1949_v55 = vmax.f32 %v1712_v32, 0.0 }
 0x360   :  { %v1941_v32 = vmax.f32 %v1688_v4, 0.0  ;;  %v1992_v11 = vmax.f32 %v1841_v26, 0.0 }
 0x361   :  { %2957 = vmatpush.xpose.msk.msrb.mxu3 %vm2004_vm2, %v1963_v14  ;;  %v1958_v14 = vmax.f32 %v1739_v54, 0.0  ;;  %v1956_v54 = vmax.f32 %v1733_v29, 0.0 }
 0x364   :  { %v1720_v16 = vpop.f32.mrf.mxu1 }
 0x365   :  { %2958 = vmatpush.xpose.msk.msrb.mxu3 %vm2004_vm2, %v1962_v0  ;;  %v1721_v38 = vadd.f32 %v4076_v53, %v1720_v16  ;;  %v1874_v0 = vadd.f32 %v4076_v53, %v1873_v19  ;;  %v1951_v16 = vmax.f32 %v1718_v5, 0.0  ;;  %v1946_v5 = vmax.f32 %v1703_v37, 0.0 }
 0x366   :  { %v1982_v37 = vmax.f32 %v1811_v50, 0.0 }
 0x367   :  { %v1952_v45 = vmax.f32 %v1721_v38, 0.0  ;;  %v2001_v38 = vmax.f32 %v1868_v44, 0.0  ;;  %v1940_v44 = vmax.f32 %v1685_v25, 0.0 }
 0x369   :  { %2959 = vmatpush.xpose.msk.msrb.mxu3 %vm2004_vm2, %v1961_v1  ;;  %v1957_v1 = vmax.f32 %v1736_v62, 0.0  ;;  %v1862_v62 = vadd.f32 %v4076_v53, %v4306_v8  ;;  %v1856_v8 = vadd.f32 %v4076_v53, %v4278_v58  ;;  %v1850_v58 = vadd.f32 %v4076_v53, %v4253_v63 }
 0x36a   :  { %v1844_v63 = vadd.f32 %v4076_v53, %v4233_v49  ;;  %v1823_v49 = vadd.f32 %v4076_v53, %v4198_v12  ;;  %v1835_v12 = vadd.f32 %v4076_v53, %v4214_v46  ;;  %v1814_v46 = vadd.f32 %v4076_v53, %v4172_v27 }
 0x36b   :  { %v1999_v19 = vmax.f32 %v1862_v62, 0.0  ;;  %v1997_v29 = vmax.f32 %v1856_v8, 0.0  ;;  %v1808_v27 = vadd.f32 %v4076_v53, %v4148_v40  ;;  %v1799_v40 = vadd.f32 %v4076_v53, %v4100_v3 }
 0x36c   :  { %v1723_v13 = vpop.f32.mrf.mxu1  ;;  %v1986_v42 = vmax.f32 %v1823_v49, 0.0  ;;  %v1787_v3 = vadd.f32 %v4076_v53, %v4057_v17  ;;  %v2429_v17 = vpop.f32.mrf.mxu3 }
 0x36d   :  { %2960 = vmatpush.xpose.msk.msrb.mxu3 %vm2004_vm2, %v1960_v59  ;;  %v1724_v15 = vadd.f32 %v4076_v53, %v1723_v13  ;;  %v2003_v59 = vmax.f32 %v1874_v0, 0.0  ;;  %v2002_v13 = vmax.f32 %v1871_v10, 0.0  ;;  %v1945_v0 = vmax.f32 %v1700_v23, 0.0 }
 0x36e   :  { %v1995_v10 = vmax.f32 %v1850_v58, 0.0  ;;  %v1796_v23 = vadd.f32 %v4076_v53, %v4087_v57  ;;  %v1784_v57 = vadd.f32 %v4076_v53, %v4047_v61 }
 0x36f   :  { %v1953_v18 = vmax.f32 %v1724_v15, 0.0  ;;  %v1865_v15 = vadd.f32 %v4076_v53, %v1864_v34  ;;  %v1947_v34 = vmax.f32 %v1706_v2, 0.0  ;;  %v1984_v2 = vmax.f32 %v1817_v41, 0.0 }
 0x370   :  { %v1977_v8 = vmax.f32 %v1796_v23, 0.0 }
 0x371   :  { %2961 = vmatpush.xpose.msk.msrb.mxu3 %vm2004_vm2, %v1959_v36  ;;  %2934 = vmatpush.xpose.msk.msrb.mxu2 %vm2004_vm2, %v1953_v18  ;;  %v1950_v36 = vmax.f32 %v1715_v56, 0.0  ;;  %v2000_v18 = vmax.f32 %v1865_v15, 0.0 }
 0x375   :  { %2962 = vmatpush.xpose.msk.msrb.mxu3 %vm2004_vm2, %v1958_v14  ;;  %2935 = vmatpush.xpose.msk.msrb.mxu2 %vm2004_vm2, %v1952_v45  ;;  %v1859_v14 = vadd.f32 %v4076_v53, %v4292_v21  ;;  %v1853_v21 = vadd.f32 %v4076_v53, %v4264_v28  ;;  %v1847_v28 = vadd.f32 %v4076_v53, %v4242_v51 }
 0x376   :  { %v1826_v51 = vadd.f32 %v4076_v53, %v4202_v30  ;;  %v1820_v30 = vadd.f32 %v4076_v53, %v4194_v60  ;;  %v1990_v60 = vmax.f32 %v1835_v12, 0.0 }
 0x377   :  { %v1998_v45 = vmax.f32 %v1859_v14, 0.0  ;;  %v1996_v56 = vmax.f32 %v1853_v21, 0.0  ;;  %v1973_v21 = vmax.f32 %v1784_v57, 0.0 }
 0x378   :  { %v1985_v15 = vmax.f32 %v1820_v30, 0.0 }
 0x379   :  { %2963 = vmatpush.xpose.msk.msrb.mxu3 %vm2004_vm2, %v1957_v1  ;;  %2936 = vmatpush.xpose.msk.msrb.mxu2 %vm2004_vm2, %v1951_v16  ;;  %v1944_v1 = vmax.f32 %v1697_v6, 0.0  ;;  %v1943_v16 = vmax.f32 %v1694_v20, 0.0  ;;  %v1975_v6 = vmax.f32 %v1790_v24, 0.0 }
 0x37d   :  { %2964 = vmatpush.xpose.msk.msrb.mxu3 %vm2004_vm2, %v1956_v54  ;;  %2937 = vmatpush.xpose.msk.msrb.mxu2 %vm2004_vm2, %v1950_v36  ;;  %v1994_v54 = vmax.f32 %v1847_v28, 0.0  ;;  %v1993_v36 = vmax.f32 %v1844_v63, 0.0 }
 0x380   :  { %2965 = vmatmul.msk.f32.vlgmr.msrb.gmra.mxu3 %vm2004_vm2, %v4130_v47 }
 0x381   :  { %2983 = vmatpush.xpose.msk.msra.mxu3 %vm2004_vm2, %v2003_v59  ;;  %2938 = vmatpush.xpose.msk.msrb.mxu2 %vm2004_vm2, %v1949_v55  ;;  %v1942_v59 = vmax.f32 %v1691_v9, 0.0  ;;  %v1991_v55 = vmax.f32 %v1838_v35, 0.0 }
 0x385   :  { %2984 = vmatpush.xpose.msk.msra.mxu3 %vm2004_vm2, %v2002_v13  ;;  %2939 = vmatpush.xpose.msk.msrb.mxu2 %vm2004_vm2, %v1948_v48  ;;  %v1987_v13 = vmax.f32 %v1826_v51, 0.0  ;;  %v1829_v48 = vadd.f32 %v4076_v53, %v4206_v39  ;;  %v1805_v39 = vadd.f32 %v4076_v53, %v4132_v31  ;;  %v1793_v31 = vadd.f32 %v4076_v53, %v4070_v52 }
 0x386   :  { %v1781_v52 = vadd.f32 %v4076_v53, %v4037_v43 }
 0x387   :  { %v1988_v62 = vmax.f32 %v1829_v48, 0.0  ;;  %v1980_v14 = vmax.f32 %v1805_v39, 0.0 }
 0x388   :  { %v1972_v33 = vmax.f32 %v1781_v52, 0.0 }
 0x389   :  { %2985 = vmatpush.xpose.msk.msra.mxu3 %vm2004_vm2, %v2001_v38  ;;  %2940 = vmatpush.xpose.msk.msrb.mxu2 %vm2004_vm2, %v1947_v34  ;;  %v1832_v38 = vadd.f32 %v4076_v53, %v4210_v22  ;;  %v1983_v22 = vmax.f32 %v1814_v46, 0.0  ;;  %v1981_v34 = vmax.f32 %v1808_v27, 0.0 }
 0x38d   :  { %2986 = vmatpush.xpose.msk.msra.mxu3 %vm2004_vm2, %v2000_v18  ;;  %2941 = vmatpush.xpose.msk.msrb.mxu2 %vm2004_vm2, %v1946_v5  ;;  %v1989_v18 = vmax.f32 %v1832_v38, 0.0  ;;  %v1978_v5 = vmax.f32 %v1799_v40, 0.0 }
 0x391   :  { %2987 = vmatpush.xpose.msk.msra.mxu3 %vm2004_vm2, %v1999_v19  ;;  %2942 = vmatpush.xpose.msk.msrb.mxu2 %vm2004_vm2, %v1945_v0  ;;  %v1979_v19 = vmax.f32 %v1802_v7, 0.0  ;;  %v1974_v0 = vmax.f32 %v1787_v3, 0.0 }
 0x395   :  { %2988 = vmatpush.xpose.msk.msra.mxu3 %vm2004_vm2, %v1998_v45  ;;  %2943 = vmatpush.xpose.msk.msrb.mxu2 %vm2004_vm2, %v1944_v1  ;;  %v1976_v45 = vmax.f32 %v1793_v31, 0.0 }
 0x399   :  { %2989 = vmatpush.xpose.msk.msra.mxu3 %vm2004_vm2, %v1997_v29  ;;  %2944 = vmatpush.xpose.msk.msrb.mxu2 %vm2004_vm2, %v1943_v16  ;;  %v2409_v29 = vpop.f32.mrf.mxu2 }
 0x39d   :  { %2990 = vmatpush.xpose.msk.msra.mxu3 %vm2004_vm2, %v1996_v56  ;;  %2945 = vmatpush.xpose.msk.msrb.mxu2 %vm2004_vm2, %v1942_v59  ;;  %v2552_v56 = vstv %s4492_s6 }
 0x39e   :  { %v2554_v43 = vadd.f32 %v2552_v56, %v2429_v17  ;;  %v2553_v59 = vadd.f32 %v2552_v56, %v2409_v29 }
 0x3a0   :  { %v2569_v63 = vrot.slane %v2554_v43, 7 }
 0x3a1   :  { %2991 = vmatpush.xpose.msk.msra.mxu3 %vm2004_vm2, %v1995_v10  ;;  %2946 = vmatpush.xpose.msk.msrb.mxu2 %vm2004_vm2, %v1941_v32  ;;  %v2449_v1 = vpop.f32.mrf.mxu2 }
 0x3a2   :  { %v2555_v9 = vadd.f32 %v2552_v56, %v2449_v1 }
 0x3a5   :  { %2992 = vmatpush.xpose.msk.msra.mxu3 %vm2004_vm2, %v1994_v54  ;;  %2947 = vmatpush.xpose.msk.msrb.mxu2 %vm2004_vm2, %v1940_v44  ;;  %v2577_v44 = vsel %vm2576_vm3, %v2553_v59, %v2569_v63 }
 0x3a8   :  { %2948 = vmatmul.msk.f32.vlgmr.msrb.gmra.mxu2 %vm2004_vm2, %v4130_v47 }
 0x3a9   :  { %2993 = vmatpush.xpose.msk.msra.mxu3 %vm2004_vm2, %v1993_v36  ;;  %2966 = vmatpush.xpose.msk.msra.mxu2 %vm2004_vm2, %v1987_v13 }
 0x3ad   :  { %2994 = vmatpush.xpose.msk.msra.mxu3 %vm2004_vm2, %v1992_v11  ;;  %2967 = vmatpush.xpose.msk.msra.mxu2 %vm2004_vm2, %v1986_v42 }
 0x3b1   :  { %2995 = vmatpush.xpose.msk.msra.mxu3 %vm2004_vm2, %v1991_v55  ;;  %2968 = vmatpush.xpose.msk.msra.mxu2 %vm2004_vm2, %v1985_v15 }
 0x3b5   :  { %2996 = vmatpush.xpose.msk.msra.mxu3 %vm2004_vm2, %v1990_v60  ;;  %2969 = vmatpush.xpose.msk.msra.mxu2 %vm2004_vm2, %v1984_v2 }
 0x3b9   :  { %2997 = vmatpush.xpose.msk.msra.mxu3 %vm2004_vm2, %v1989_v18  ;;  %2970 = vmatpush.xpose.msk.msra.mxu2 %vm2004_vm2, %v1983_v22 }
 0x3bd   :  { %2998 = vmatpush.xpose.msk.msra.mxu3 %vm2004_vm2, %v1988_v62  ;;  %2971 = vmatpush.xpose.msk.msra.mxu2 %vm2004_vm2, %v1982_v37 }
 0x3c0   :  { %2999 = vmatmul.msk.f32.vlgmr.msra.gmra.mxu3 %vm2004_vm2, %v4130_v47 }
 0x3c1   :  { %2972 = vmatpush.xpose.msk.msra.mxu2 %vm2004_vm2, %v1981_v34 }
 0x3c3   :  { %v2469_v20 = vpop.f32.mrf.mxu3 }
 0x3c4   :  { %v2556_v16 = vadd.f32 %v2552_v56, %v2469_v20 }
 0x3c5   :  { %2973 = vmatpush.xpose.msk.msra.mxu2 %vm2004_vm2, %v1980_v14 }
 0x3c6   :  { %v2571_v54 = vrot.slane %v2556_v16, 5 }
 0x3c9   :  { %2974 = vmatpush.xpose.msk.msra.mxu2 %vm2004_vm2, %v1979_v19 }
 0x3cd   :  { %2975 = vmatpush.xpose.msk.msra.mxu2 %vm2004_vm2, %v1978_v5 }
 0x3d1   :  { %2976 = vmatpush.xpose.msk.msra.mxu2 %vm2004_vm2, %v1977_v8 }
 0x3d5   :  { %2977 = vmatpush.xpose.msk.msra.mxu2 %vm2004_vm2, %v1976_v45 }
 0x3d9   :  { %2978 = vmatpush.xpose.msk.msra.mxu2 %vm2004_vm2, %v1975_v6 }
 0x3dd   :  { %2979 = vmatpush.xpose.msk.msra.mxu2 %vm2004_vm2, %v1974_v0 }
 0x3e1   :  { %2980 = vmatpush.xpose.msk.msra.mxu2 %vm2004_vm2, %v1973_v21 }
 0x3e5   :  { %2981 = vmatpush.xpose.msk.msra.mxu2 %vm2004_vm2, %v1972_v33 }
 0x3e8   :  { %2982 = vmatmul.msk.f32.vlgmr.msra.gmra.mxu2 %vm2004_vm2, %v4130_v47  ;;  %v2570_v47 = vrot.slane %v2555_v9, 6 }
 0x3ea   :  { %v2579_v49 = vsel %vm2578_vm4, %v2570_v47, %v2571_v54 }
 0x3eb   :  { %v2581_v30 = vsel %vm2580_vm7, %v2577_v44, %v2579_v49 }
 0x403   :  { %v2509_v61 = vpop.f32.mrf.mxu3 }
 0x404   :  { %v2558_v10 = vadd.f32 %v2552_v56, %v2509_v61 }
 0x406   :  { %v2573_v51 = vrot.slane %v2558_v10, 3 }
 0x42b   :  { %v2489_v58 = vpop.f32.mrf.mxu2 }
 0x42c   :  { %v2557_v28 = vadd.f32 %v2552_v56, %v2489_v58 }
 0x42e   :  { %v2572_v32 = vrot.slane %v2557_v28, 4 }
 0x430   :  { %v2583_v35 = vsel %vm2582_vm5, %v2572_v32, %v2573_v51 }
 0x443   :  { %v2549_v53 = vpop.f32.mrf.mxu3 }
 0x444   :  { %v2560_v4 = vadd.f32 %v2552_v56, %v2549_v53 }
 0x446   :  { %v2575_v36 = vrot.slane %v2560_v4, 1 }
 0x46b   :  { %v2529_v25 = vpop.f32.mrf.mxu2 }
 0x46c   :  { %v2559_v26 = vadd.f32 %v2552_v56, %v2529_v25 }
 0x46e   :  { %v2574_v13 = vrot.slane %v2559_v26, 2 }
 0x470   :  { %v2585_v11 = vsel %vm2584_vm6, %v2574_v13, %v2575_v36 }
 0x471   :  { %v2587_v42 = vsel %vm2586_vm8, %v2583_v35, %v2585_v11 }
 0x472   :  { %v2589_v12 = vsel %vm2588_vm9, %v2581_v30, %v2587_v42 }
 0x473   :  { %2591 = vst [vmem:[#allocation3] sm:$0xff] %v2589_v12 }
 0x474   :  { %2595 = vsyncadd [#allocation4], 112  ;;  %s2599_s10 = sshll.u32 %s4493_s7, 4  ;;  %s3041_s1 = smov [#allocation3]   ;;  %s2600_s10 = int_to_ptr.hbm [resolvable:$true] %s2599_s10 }
 0x475   :  { %s2597_s11 = sshll.u32 %s3041_s1, 4  ;;  %s2598_s11 = int_to_ptr.vmem [resolvable:$true] %s2597_s11 }
 0x476   :  { %2602 = dma.vmem_to_hbm [thread:$0]  %s2598_s11, 16, %s2600_s10, [#allocation4]  }
 0x477   :  { %3039 = dma.done.wait [#allocation4], 128  }
 0x478   :  { %3040 = vsyncadd [#allocation4], 4294967168 }
 0x479   :  { %2607 = vsyncpa [#allocation4], 1 }

</bundles_post_ra>
